<compile_context>
chip_gen: v6e
topology: v6e:2x2x1
jax: 0.10.0
libtpu: 0.0.40
codegen_flags: <defaults>
</compile_context>

<pallas_src>
import jax
import jax.numpy as jnp
from jax.experimental import pallas as pl
from jax.experimental.pallas import tpu as pltpu


def _round_up(x, m):
    return (x + m - 1) // m * m


# ---------------------------------------------------------------------------
# Pallas kernel: K-tiled image MLP + resident text MLP + similarity head.
# ---------------------------------------------------------------------------
def clip_kernel(img_ref, w1i_ref, b1i_ref, w2i_ref, b2i_ref,
                txt_ref, w1t_ref, b1t_ref, w2t_ref, b2t_ref,
                sim_ref, acc_ref):
    k = pl.program_id(1)

    @pl.when(k == 0)
    def _init():
        # Seed accumulator with the broadcast first-layer bias (saves an f32
        # add in the finalize branch).
        acc_ref[...] = jnp.broadcast_to(b1i_ref[...], acc_ref.shape)

    # Steady state: bf16 MXU matmul over one K tile, f32 accumulation.
    acc_ref[...] += jnp.dot(img_ref[...], w1i_ref[...],
                            preferred_element_type=jnp.float32)

    @pl.when(k == pl.num_programs(1) - 1)
    def _finalize():
        # Image encoder tail: ReLU in f32, second matmul on the MXU in bf16.
        h_i = jnp.maximum(acc_ref[...], 0.0)
        f_i = jnp.dot(h_i.astype(jnp.bfloat16), w2i_ref[...],
                      preferred_element_type=jnp.float32) + b2i_ref[...]

        # Text encoder (small, fully VMEM-resident; recomputed per batch
        # tile).
        # TODO(synk): for very large batch, cache f_t in a per-core VMEM
        # scratch instead of recomputing per batch tile.
        h_t = jnp.dot(txt_ref[...], w1t_ref[...],
                      preferred_element_type=jnp.float32) + b1t_ref[...]
        h_t = jnp.maximum(h_t, 0.0)
        f_t = jnp.dot(h_t.astype(jnp.bfloat16), w2t_ref[...],
                      preferred_element_type=jnp.float32) + b2t_ref[...]

        # CLIP head: contract over the embed dim directly.  Lane-dense
        # [tm, Bp] f32 store.
        sim_ref[...] = jax.lax.dot_general(
            f_i.astype(jnp.bfloat16), f_t.astype(jnp.bfloat16),
            dimension_numbers=(((1,), (1,)), ((), ())),
            preferred_element_type=jnp.float32)


# ---------------------------------------------------------------------------
# Wrapper: glue (flatten / embed+pool), padding, tiling, pallas_call.
# ---------------------------------------------------------------------------
def clip_forward(img_x, text_ids, params, *, tm=128, tk=2048):
    """img_x: [B, C, H, W] float32 (NCHW), text_ids: [B, T] int32."""
    B = img_x.shape[0]

    # ---- glue (plain JAX): flatten image, embed + mean-pool text ----------
    img_flat = img_x.reshape(B, -1)                               # [B, K] f32
    tok_emb = jnp.take(params["emb_table"], text_ids, axis=0)     # [B, T, E]
    txt_pooled = tok_emb.astype(jnp.float32).mean(axis=1)         # [B, E] f32
    # TODO(synk): for large T*E, move the gather/mean into the kernel with
    # PrefetchScalarGridSpec(num_scalar_prefetch=1) + manual DMA of emb rows.

    K = img_flat.shape[1]
    E = txt_pooled.shape[1]
    Hd = params["w1i"].shape[1]
    D = params["w2i"].shape[1]

    Hp = _round_up(Hd, 128)
    Dp = _round_up(D, 128)
    Ep = _round_up(E, 128)

    # ---- device VMEM query (v7x: 64 MiB per TC) and adaptive K tile -------
    try:
        vmem_cap = pltpu.get_tpu_info().vmem_capacity_bytes
    except Exception:
        vmem_cap = 64 << 20
    # Largest multiple of 128 whose double-buffered (img tile + w1i tile)
    # bf16 footprint fits in ~40% of VMEM, capped at the padded K.
    k_budget = int(0.40 * vmem_cap)
    bytes_per_tk = 2 * (tm + Hp) * 2       # double-buffered bf16 per unit tk
    tk_cap = max(128, (k_budget // bytes_per_tk) // 128 * 128)
    tk = min(max(tk, 128), tk_cap, _round_up(K, 128))

    # ---- pad to MXU / vreg friendly sizes (zero padding preserves math) ---
    Bp = _round_up(max(B, tm), tm)     # batch multiple of tm (>=128): sim
                                       # output last dim is lane-dense
    Kp = _round_up(K, tk)

    def pad2(a, rows, cols):
        return jnp.pad(a, ((0, rows - a.shape[0]), (0, cols - a.shape[1])))

    img_p = pad2(img_flat, Bp, Kp).astype(jnp.bfloat16)
    txt_p = pad2(txt_pooled, Bp, Ep).astype(jnp.bfloat16)

    w1i = pad2(params["w1i"], Kp, Hp)            # bf16
    b1i = pad2(params["b1i"], 1, Hp)             # f32
    w2i = pad2(params["w2i"], Hp, Dp)
    b2i = pad2(params["b2i"], 1, Dp)
    w1t = pad2(params["w1t"], Ep, Hp)
    b1t = pad2(params["b1t"], 1, Hp)
    w2t = pad2(params["w2t"], Hp, Dp)
    b2t = pad2(params["b2t"], 1, Dp)

    grid = (Bp // tm, Kp // tk)

    # ---- VMEM limit: double-buffered tile footprint + headroom, capped ----
    bf16_b, f32_b = 2, 4
    footprint = (
        2 * tm * tk * bf16_b            # img tile (double-buffered)
        + 2 * tk * Hp * bf16_b          # w1i tile (double-buffered)
        + 2 * 2 * Hp * Dp * bf16_b      # w2i, w2t (resident, 2 buffers each)
        + 2 * (Bp * Ep + Ep * Hp) * bf16_b
        + 2 * 2 * (Hp + Dp) * f32_b     # biases
        + 2 * tm * Bp * f32_b           # sim output tile
        + tm * Hp * f32_b               # accumulator scratch
    )
    vmem_limit = int(min(2 * footprint + (8 << 20), int(0.75 * vmem_cap)))

    # ---- advisory cost estimate for XLA scheduling -------------------------
    n_btile = Bp // tm
    flops = (2 * Bp * Kp * Hp
             + 2 * Bp * Hp * Dp
             + n_btile * (2 * Bp * Ep * Hp + 2 * Bp * Hp * Dp)
             + 2 * Bp * Dp * Bp)
    bytes_accessed = (img_p.size * bf16_b + txt_p.size * bf16_b
                      + (w1i.size + w2i.size + w1t.size + w2t.size) * bf16_b
                      + (b1i.size + b2i.size + b1t.size + b2t.size) * f32_b
                      + Bp * Bp * f32_b)
    cost = pl.CostEstimate(flops=int(flops), transcendentals=0,
                           bytes_accessed=int(bytes_accessed))

    operands = (img_p, w1i, b1i, w2i, b2i, txt_p, w1t, b1t, w2t, b2t)

    sim_padded = pl.pallas_call(
        clip_kernel,
        out_shape=jax.ShapeDtypeStruct((Bp, Bp), jnp.float32),
        grid_spec=pltpu.PrefetchScalarGridSpec(
            num_scalar_prefetch=0,
            grid=grid,
            in_specs=[
                pl.BlockSpec((tm, tk), lambda i, k: (i, k)),   # img tile
                pl.BlockSpec((tk, Hp), lambda i, k: (k, 0)),   # w1i tile
                pl.BlockSpec((1, Hp), lambda i, k: (0, 0)),    # b1i
                pl.BlockSpec((Hp, Dp), lambda i, k: (0, 0)),   # w2i
                pl.BlockSpec((1, Dp), lambda i, k: (0, 0)),    # b2i
                pl.BlockSpec((Bp, Ep), lambda i, k: (0, 0)),   # txt pooled
                pl.BlockSpec((Ep, Hp), lambda i, k: (0, 0)),   # w1t
                pl.BlockSpec((1, Hp), lambda i, k: (0, 0)),    # b1t
                pl.BlockSpec((Hp, Dp), lambda i, k: (0, 0)),   # w2t
                pl.BlockSpec((1, Dp), lambda i, k: (0, 0)),    # b2t
            ],
            out_specs=pl.BlockSpec((tm, Bp), lambda i, k: (i, 0)),
            scratch_shapes=[pltpu.VMEM((tm, Hp), jnp.float32)],
        ),
        compiler_params=pltpu.CompilerParams(
            dimension_semantics=("parallel", "arbitrary"),
            vmem_limit_bytes=vmem_limit,
        ),
        cost_estimate=cost,
    )(*operands)

    return sim_padded[:B, :B]


# ---------------------------------------------------------------------------
# Deterministic params (bf16 weights, f32 biases) + pure-JAX reference.
# ---------------------------------------------------------------------------
def make_params(key, *, img_in, hidden, embed_dim, vocab, emb_in):
    keys = jax.random.split(key, 9)
    scale = 0.02

    def w(k, shape):
        return (scale * jax.random.normal(k, shape, jnp.float32)).astype(jnp.bfloat16)

    def b(k, shape):
        return 0.01 * jax.random.normal(k, shape, jnp.float32)

    return {
        "w1i": w(keys[0], (img_in, hidden)),
        "b1i": b(keys[1], (1, hidden)),
        "w2i": w(keys[2], (hidden, embed_dim)),
        "b2i": b(keys[3], (1, embed_dim)),
        "emb_table": w(keys[4], (vocab, emb_in)),
        "w1t": w(keys[5], (emb_in, hidden)),
        "b1t": b(keys[6], (1, hidden)),
        "w2t": w(keys[7], (hidden, embed_dim)),
        "b2t": b(keys[8], (1, embed_dim)),
    }


def clip_reference(img_x, text_ids, params):
    B = img_x.shape[0]
    img = img_x.reshape(B, -1).astype(jnp.bfloat16)
    h_i = jnp.maximum(
        jnp.dot(img, params["w1i"], preferred_element_type=jnp.float32)
        + params["b1i"], 0.0)
    f_i = jnp.dot(h_i.astype(jnp.bfloat16), params["w2i"],
                  preferred_element_type=jnp.float32) + params["b2i"]

    tok = jnp.take(params["emb_table"], text_ids, axis=0)
    txt = tok.astype(jnp.float32).mean(axis=1).astype(jnp.bfloat16)
    h_t = jnp.maximum(
        jnp.dot(txt, params["w1t"], preferred_element_type=jnp.float32)
        + params["b1t"], 0.0)
    f_t = jnp.dot(h_t.astype(jnp.bfloat16), params["w2t"],
                  preferred_element_type=jnp.float32) + params["b2t"]

    return jax.lax.dot_general(
        f_i.astype(jnp.bfloat16), f_t.astype(jnp.bfloat16),
        dimension_numbers=(((1,), (1,)), ((), ())),
        preferred_element_type=jnp.float32)


if __name__ == "__main__":
    # Small shapes consistent with the module's forward.
    B, C, Himg, Wimg = 2, 4, 16, 16      # image: NCHW
    T, VOCAB = 8, 32                     # text: token ids
    HIDDEN, EMBED, EMB_IN = 128, 64, 64

    key = jax.random.PRNGKey(0)
    k_img, k_txt, k_par = jax.random.split(key, 3)

    img_x = jax.random.normal(k_img, (B, C, Himg, Wimg), jnp.float32)
    text_ids = jax.random.randint(k_txt, (B, T), 0, VOCAB, jnp.int32)

    params = make_params(k_par, img_in=C * Himg * Wimg, hidden=HIDDEN,
                         embed_dim=EMBED, vocab=VOCAB, emb_in=EMB_IN)

    sim = jax.block_until_ready(clip_forward(img_x, text_ids, params))
    ref = jax.block_until_ready(clip_reference(img_x, text_ids, params))

    assert sim.shape == (B, B), sim.shape
    assert jnp.allclose(sim, ref, atol=2e-2, rtol=2e-2), (sim, ref)

    print("KERNEL_OK")
</pallas_src>

<mosaic_0001>
module attributes {stable_mosaic.version = 11 : i64} {
  func.func @clip_kernel(%arg0: i32, %arg1: i32, %arg2: memref<128x1024xbf16, #tpu.memory_space<vmem>>, %arg3: memref<1024x128xbf16, #tpu.memory_space<vmem>>, %arg4: memref<1x128xf32, #tpu.memory_space<vmem>>, %arg5: memref<128x128xbf16, #tpu.memory_space<vmem>>, %arg6: memref<1x128xf32, #tpu.memory_space<vmem>>, %arg7: memref<128x128xbf16, #tpu.memory_space<vmem>>, %arg8: memref<128x128xbf16, #tpu.memory_space<vmem>>, %arg9: memref<1x128xf32, #tpu.memory_space<vmem>>, %arg10: memref<128x128xbf16, #tpu.memory_space<vmem>>, %arg11: memref<1x128xf32, #tpu.memory_space<vmem>>, %arg12: memref<128x128xf32, #tpu.memory_space<vmem>>, %arg13: memref<128x128xf32, #tpu.memory_space<vmem>>) attributes {dimension_semantics = [#tpu.dimension_semantics<parallel>, #tpu.dimension_semantics<arbitrary>], iteration_bounds = array<i64: 1, 1>, scalar_prefetch = 0 : i64, scratch_operands = 1 : i64, tpu.core_type = #tpu.core_type<tc>, window_params = [{transform_indices = @transform_0, window_bounds = array<i64: 128, 1024>}, {transform_indices = @transform_1, window_bounds = array<i64: 1024, 128>}, {pipeline_mode = #tpu.pipeline_mode<synchronous>, transform_indices = @transform_2, window_bounds = array<i64: 1, 128>}, {pipeline_mode = #tpu.pipeline_mode<synchronous>, transform_indices = @transform_3, window_bounds = array<i64: 128, 128>}, {pipeline_mode = #tpu.pipeline_mode<synchronous>, transform_indices = @transform_4, window_bounds = array<i64: 1, 128>}, {pipeline_mode = #tpu.pipeline_mode<synchronous>, transform_indices = @transform_5, window_bounds = array<i64: 128, 128>}, {pipeline_mode = #tpu.pipeline_mode<synchronous>, transform_indices = @transform_6, window_bounds = array<i64: 128, 128>}, {pipeline_mode = #tpu.pipeline_mode<synchronous>, transform_indices = @transform_7, window_bounds = array<i64: 1, 128>}, {pipeline_mode = #tpu.pipeline_mode<synchronous>, transform_indices = @transform_8, window_bounds = array<i64: 128, 128>}, {pipeline_mode = #tpu.pipeline_mode<synchronous>, transform_indices = @transform_9, window_bounds = array<i64: 1, 128>}, {transform_indices = @transform_10, window_bounds = array<i64: 128, 128>}]} {
    %c0_i32 = arith.constant 0 : i32
    %0 = arith.cmpi eq, %arg1, %c0_i32 : i32
    %1 = arith.extui %0 : i1 to i32
    %c0_i32_0 = arith.constant 0 : i32
    %2 = arith.cmpi ne, %1, %c0_i32_0 : i32
    scf.if %2 {
      %c0_10 = arith.constant 0 : index
      %c0_11 = arith.constant 0 : index
      %12 = vector.load %arg4[%c0_10, %c0_11] : memref<1x128xf32, #tpu.memory_space<vmem>>, vector<1x128xf32>
      %13 = vector.shape_cast %12 : vector<1x128xf32> to vector<1x128xf32>
      %14 = vector.broadcast %13 : vector<1x128xf32> to vector<128x128xf32>
      %c0_12 = arith.constant 0 : index
      %c0_13 = arith.constant 0 : index
      %15 = vector.load %arg13[%c0_12, %c0_13] : memref<128x128xf32, #tpu.memory_space<vmem>>, vector<128x128xf32>
      tpu.vector_store %arg13[%c0_12, %c0_13], %14 {strides = array<i32>} : memref<128x128xf32, #tpu.memory_space<vmem>>, vector<128x128xf32>,
    } else {
    }
    %c0 = arith.constant 0 : index
    %c0_1 = arith.constant 0 : index
    %3 = vector.load %arg13[%c0, %c0_1] : memref<128x128xf32, #tpu.memory_space<vmem>>, vector<128x128xf32>
    %c0_2 = arith.constant 0 : index
    %c0_3 = arith.constant 0 : index
    %4 = vector.load %arg2[%c0_2, %c0_3] : memref<128x1024xbf16, #tpu.memory_space<vmem>>, vector<128x1024xbf16>
    %c0_4 = arith.constant 0 : index
    %c0_5 = arith.constant 0 : index
    %5 = vector.load %arg3[%c0_4, %c0_5] : memref<1024x128xbf16, #tpu.memory_space<vmem>>, vector<1024x128xbf16>
    %cst = arith.constant dense<0.000000e+00> : vector<128x128xf32>
    %6 = tpu.matmul %4, %5, %cst {dimension_numbers = #tpu.dot_dimension_numbers<[1], [0], [0], [1], [0, 0, 1, 1], [], []>} : vector<128x1024xbf16>, vector<1024x128xbf16>, vector<128x128xf32> -> vector<128x128xf32>
    %7 = arith.addf %3, %6 : vector<128x128xf32>
    %c0_6 = arith.constant 0 : index
    %c0_7 = arith.constant 0 : index
    %8 = vector.load %arg13[%c0_6, %c0_7] : memref<128x128xf32, #tpu.memory_space<vmem>>, vector<128x128xf32>
    tpu.vector_store %arg13[%c0_6, %c0_7], %7 {strides = array<i32>} : memref<128x128xf32, #tpu.memory_space<vmem>>, vector<128x128xf32>,
    %c0_i32_8 = arith.constant 0 : i32
    %9 = arith.cmpi eq, %arg1, %c0_i32_8 : i32
    %10 = arith.extui %9 : i1 to i32
    %c0_i32_9 = arith.constant 0 : i32
    %11 = arith.cmpi ne, %10, %c0_i32_9 : i32
    scf.if %11 {
      %c0_10 = arith.constant 0 : index
      %c0_11 = arith.constant 0 : index
      %12 = vector.load %arg13[%c0_10, %c0_11] : memref<128x128xf32, #tpu.memory_space<vmem>>, vector<128x128xf32>
      %cst_12 = arith.constant 0.000000e+00 : f32
      %13 = vector.broadcast %cst_12 : f32 to vector<128x128xf32>
      %14 = arith.maximumf %12, %13 : vector<128x128xf32>
      %15 = arith.truncf %14 : vector<128x128xf32> to vector<128x128xbf16>
      %c0_13 = arith.constant 0 : index
      %c0_14 = arith.constant 0 : index
      %16 = vector.load %arg5[%c0_13, %c0_14] : memref<128x128xbf16, #tpu.memory_space<vmem>>, vector<128x128xbf16>
      %cst_15 = arith.constant dense<0.000000e+00> : vector<128x128xf32>
      %17 = tpu.matmul %15, %16, %cst_15 {dimension_numbers = #tpu.dot_dimension_numbers<[1], [0], [0], [1], [0, 0, 1, 1], [], []>} : vector<128x128xbf16>, vector<128x128xbf16>, vector<128x128xf32> -> vector<128x128xf32>
      %c0_16 = arith.constant 0 : index
      %c0_17 = arith.constant 0 : index
      %18 = vector.load %arg6[%c0_16, %c0_17] : memref<1x128xf32, #tpu.memory_space<vmem>>, vector<1x128xf32>
      %19 = vector.broadcast %18 : vector<1x128xf32> to vector<128x128xf32>
      %20 = arith.addf %17, %19 : vector<128x128xf32>
      %c0_18 = arith.constant 0 : index
      %c0_19 = arith.constant 0 : index
      %21 = vector.load %arg7[%c0_18, %c0_19] : memref<128x128xbf16, #tpu.memory_space<vmem>>, vector<128x128xbf16>
      %c0_20 = arith.constant 0 : index
      %c0_21 = arith.constant 0 : index
      %22 = vector.load %arg8[%c0_20, %c0_21] : memref<128x128xbf16, #tpu.memory_space<vmem>>, vector<128x128xbf16>
      %cst_22 = arith.constant dense<0.000000e+00> : vector<128x128xf32>
      %23 = tpu.matmul %21, %22, %cst_22 {dimension_numbers = #tpu.dot_dimension_numbers<[1], [0], [0], [1], [0, 0, 1, 1], [], []>} : vector<128x128xbf16>, vector<128x128xbf16>, vector<128x128xf32> -> vector<128x128xf32>
      %c0_23 = arith.constant 0 : index
      %c0_24 = arith.constant 0 : index
      %24 = vector.load %arg9[%c0_23, %c0_24] : memref<1x128xf32, #tpu.memory_space<vmem>>, vector<1x128xf32>
      %25 = vector.broadcast %24 : vector<1x128xf32> to vector<128x128xf32>
      %26 = arith.addf %23, %25 : vector<128x128xf32>
      %cst_25 = arith.constant 0.000000e+00 : f32
      %27 = vector.broadcast %cst_25 : f32 to vector<128x128xf32>
      %28 = arith.maximumf %26, %27 : vector<128x128xf32>
      %29 = arith.truncf %28 : vector<128x128xf32> to vector<128x128xbf16>
      %c0_26 = arith.constant 0 : index
      %c0_27 = arith.constant 0 : index
      %30 = vector.load %arg10[%c0_26, %c0_27] : memref<128x128xbf16, #tpu.memory_space<vmem>>, vector<128x128xbf16>
      %cst_28 = arith.constant dense<0.000000e+00> : vector<128x128xf32>
      %31 = tpu.matmul %29, %30, %cst_28 {dimension_numbers = #tpu.dot_dimension_numbers<[1], [0], [0], [1], [0, 0, 1, 1], [], []>} : vector<128x128xbf16>, vector<128x128xbf16>, vector<128x128xf32> -> vector<128x128xf32>
      %c0_29 = arith.constant 0 : index
      %c0_30 = arith.constant 0 : index
      %32 = vector.load %arg11[%c0_29, %c0_30] : memref<1x128xf32, #tpu.memory_space<vmem>>, vector<1x128xf32>
      %33 = vector.broadcast %32 : vector<1x128xf32> to vector<128x128xf32>
      %34 = arith.addf %31, %33 : vector<128x128xf32>
      %35 = arith.truncf %20 : vector<128x128xf32> to vector<128x128xbf16>
      %36 = arith.truncf %34 : vector<128x128xf32> to vector<128x128xbf16>
      %cst_31 = arith.constant dense<0.000000e+00> : vector<128x128xf32>
      %37 = tpu.matmul %35, %36, %cst_31 {dimension_numbers = #tpu.dot_dimension_numbers<[1], [1], [0], [0], [0, 0, 1, 0], [], []>} : vector<128x128xbf16>, vector<128x128xbf16>, vector<128x128xf32> -> vector<128x128xf32>
      %c0_32 = arith.constant 0 : index
      %c0_33 = arith.constant 0 : index
      %38 = vector.load %arg12[%c0_32, %c0_33] : memref<128x128xf32, #tpu.memory_space<vmem>>, vector<128x128xf32>
      tpu.vector_store %arg12[%c0_32, %c0_33], %37 {strides = array<i32>} : memref<128x128xf32, #tpu.memory_space<vmem>>, vector<128x128xf32>,
    } else {
    }
    return
  }
  func.func @transform_0(%arg0: i32, %arg1: i32) -> (i32, i32) {
    %c0_i32 = arith.constant 0 : i32
    return %arg0, %arg1 : i32, i32
  }
  func.func @transform_1(%arg0: i32, %arg1: i32) -> (i32, i32) {
    %c0_i32 = arith.constant 0 : i32
    %c0_i32_0 = arith.constant 0 : i32
    return %arg1, %c0_i32 : i32, i32
  }
  func.func @transform_2(%arg0: i32, %arg1: i32) -> (i32, i32) {
    %c0_i32 = arith.constant 0 : i32
    %c0_i32_0 = arith.constant 0 : i32
    %c0_i32_1 = arith.constant 0 : i32
    return %c0_i32, %c0_i32_0 : i32, i32
  }
  func.func @transform_3(%arg0: i32, %arg1: i32) -> (i32, i32) {
    %c0_i32 = arith.constant 0 : i32
    %c0_i32_0 = arith.constant 0 : i32
    %c0_i32_1 = arith.constant 0 : i32
    return %c0_i32, %c0_i32_0 : i32, i32
  }
  func.func @transform_4(%arg0: i32, %arg1: i32) -> (i32, i32) {
    %c0_i32 = arith.constant 0 : i32
    %c0_i32_0 = arith.constant 0 : i32
    %c0_i32_1 = arith.constant 0 : i32
    return %c0_i32, %c0_i32_0 : i32, i32
  }
  func.func @transform_5(%arg0: i32, %arg1: i32) -> (i32, i32) {
    %c0_i32 = arith.constant 0 : i32
    %c0_i32_0 = arith.constant 0 : i32
    %c0_i32_1 = arith.constant 0 : i32
    return %c0_i32, %c0_i32_0 : i32, i32
  }
  func.func @transform_6(%arg0: i32, %arg1: i32) -> (i32, i32) {
    %c0_i32 = arith.constant 0 : i32
    %c0_i32_0 = arith.constant 0 : i32
    %c0_i32_1 = arith.constant 0 : i32
    return %c0_i32, %c0_i32_0 : i32, i32
  }
  func.func @transform_7(%arg0: i32, %arg1: i32) -> (i32, i32) {
    %c0_i32 = arith.constant 0 : i32
    %c0_i32_0 = arith.constant 0 : i32
    %c0_i32_1 = arith.constant 0 : i32
    return %c0_i32, %c0_i32_0 : i32, i32
  }
  func.func @transform_8(%arg0: i32, %arg1: i32) -> (i32, i32) {
    %c0_i32 = arith.constant 0 : i32
    %c0_i32_0 = arith.constant 0 : i32
    %c0_i32_1 = arith.constant 0 : i32
    return %c0_i32, %c0_i32_0 : i32, i32
  }
  func.func @transform_9(%arg0: i32, %arg1: i32) -> (i32, i32) {
    %c0_i32 = arith.constant 0 : i32
    %c0_i32_0 = arith.constant 0 : i32
    %c0_i32_1 = arith.constant 0 : i32
    return %c0_i32, %c0_i32_0 : i32, i32
  }
  func.func @transform_10(%arg0: i32, %arg1: i32) -> (i32, i32) {
    %c0_i32 = arith.constant 0 : i32
    %c0_i32_0 = arith.constant 0 : i32
    return %arg0, %c0_i32 : i32, i32
  }
}

</mosaic_0001>

<bundles_post_ra>
// kernel: tpu_custom_call.1
= control target key start
LH: loop header
LB: loop body
LE: loop exit
PB: predicated region body
PF: predicated region fallthrough
CT: control target
= control target key end

     0   :  { %15 = vsyncpa [#allocation4], 0  ;;  %s3469_s0 = inlined_call_operand.hbm [shape: bf16[128,1024], index: 0, kind: input, shape index: {}]   ;;  %s3470_s1 = inlined_call_operand.hbm [shape: bf16[1024,128], index: 1, kind: input, shape index: {}]   ;;  %s3471_s2 = inlined_call_operand.vmem [shape: f32[1,128], index: 2, kind: input, shape index: {}]   ;;  %s3472_s3 = inlined_call_operand.hbm [shape: bf16[128,128], index: 3, kind: input, shape index: {}]   ;;  %s3473_s4 = inlined_call_operand.vmem [shape: f32[1,128], index: 4, kind: input, shape index: {}]   ;;  %s3474_s5 = inlined_call_operand.hbm [shape: bf16[128,128], index: 5, kind: input, shape index: {}]   ;;  %s3475_s6 = inlined_call_operand.hbm [shape: bf16[128,128], index: 6, kind: input, shape index: {}]   ;;  %s3476_s7 = inlined_call_operand.vmem [shape: f32[1,128], index: 7, kind: input, shape index: {}]   ;;  %s3477_s8 = inlined_call_operand.hbm [shape: bf16[128,128], index: 8, kind: input, shape index: {}]   ;;  %s3478_s9 = inlined_call_operand.vmem [shape: f32[1,128], index: 9, kind: input, shape index: {}]   ;;  %s3479_s10 = inlined_call_operand.hbm [shape: f32[128,128], index: 10, kind: output, shape index: {}]  }
   0x1   :  { %16 = vsyncpa [#allocation7], 0 }
   0x2   :  { %17 = vsyncpa [#allocation10], 0 }
   0x3   :  { %18 = vsyncpa [#allocation13], 0 }
   0x4   :  { %19 = vsyncpa [#allocation5], 0  ;;  %s3133_s13 = smov [#allocation6]  }
   0x5   :  { %s37_s14 = sshll.u32 %s3133_s13, 4  ;;  %s38_s14 = int_to_ptr.vmem [resolvable:$true] %s37_s14 }
   0x6   :  { %s2991_s15 = scalar_lea.vmem %s38_s14, 8192  ;;  %p2996_p1 = scmp.lt.s32.totalorder %s38_s14, %s38_s14 }
   0x7   :  { %p2992_p0 = scmp.ne.s32.totalorder %s38_s14, %s2991_s15  ;;  %p2997_p2 = scmp.lt.s32.totalorder %s2991_s15, %s2991_s15 }
   0x9   :  { %p2998_p3 = por %p2997_p2, %p2996_p1 }
   0xb   :  { %p2999_p4 = pnand %p2998_p3, %p2992_p0 }
   0xd   :  { %3002 = shalt.err (!%p2999_p4)
}
   0xe   :  { %s3134_s16 = smov 64   ;;  %s3135_s17 = smov 4  }
   0xf   :  { %43 = dma.hbm_to_vmem [thread:$0]  %s3470_s1, 8192, %s38_s14, [#allocation7], %s3134_s16, %s3134_s16, %s3135_s17  }
  0x10   :  { %s3136_s20 = smov [#allocation9]   ;;  %s3137_s22 = smov [#allocation3]  }
  0x11   :  { %s65_s21 = sshll.u32 %s3136_s20, 4  ;;  %s25_s23 = sshll.u32 %s3137_s22, 4  ;;  %s66_s21 = int_to_ptr.vmem [resolvable:$true] %s65_s21  ;;  %s26_s23 = int_to_ptr.vmem [resolvable:$true] %s25_s23 }
  0x12   :  { %s3011_s24 = scalar_lea.vmem %s66_s21, 1024  ;;  %p3016_p6 = scmp.lt.s32.totalorder %s66_s21, %s66_s21 }
  0x13   :  { %p3012_p5 = scmp.ne.s32.totalorder %s66_s21, %s3011_s24  ;;  %p3017_p7 = scmp.lt.s32.totalorder %s3011_s24, %s3011_s24 }
  0x15   :  { %p3018_p8 = por %p3017_p7, %p3016_p6 }
  0x17   :  { %p3019_p9 = pnand %p3018_p8, %p3012_p5 }
  0x19   :  { %3022 = shalt.err (!%p3019_p9)
}
  0x1a   :  { %71 = dma.hbm_to_vmem [thread:$0]  %s3474_s5, 1024, %s66_s21, [#allocation10], %s3134_s16, %s3134_s16, %s3135_s17  }
  0x1b   :  { %s3031_s1 = scalar_lea.vmem %s26_s23, 8192  ;;  %p3036_p11 = scmp.lt.s32.totalorder %s26_s23, %s26_s23 }
  0x1c   :  { %p3032_p10 = scmp.ne.s32.totalorder %s26_s23, %s3031_s1  ;;  %p3037_p12 = scmp.lt.s32.totalorder %s3031_s1, %s3031_s1 }
  0x1e   :  { %p3038_p13 = por %p3037_p12, %p3036_p11 }
  0x20   :  { %p3039_p0 = pnand %p3038_p13, %p3032_p10 }
  0x22   :  { %3042 = shalt.err (!%p3039_p0)
}
  0x23   :  { %s3138_s27 = smov 512   ;;  %s3139_s28 = smov 32  }
  0x24   :  { %31 = dma.hbm_to_vmem [thread:$0]  %s3469_s0, 8192, %s26_s23, [#allocation4], %s3138_s27, %s3138_s27, %s3139_s28  }
  0x25   :  { %s3140_s11 = smov [#allocation8]   ;;  %s3141_s13 = smov [#allocation11]  }
  0x26   :  { %s51_s12 = sshll.u32 %s3140_s11, 4  ;;  %s77_s14 = sshll.u32 %s3141_s13, 4  ;;  %s52_s12 = int_to_ptr.vmem [resolvable:$true] %s51_s12  ;;  %s78_s14 = int_to_ptr.vmem [resolvable:$true] %s77_s14 }
  0x27   :  { %s3051_s5 = scalar_lea.vmem %s52_s12, 1024  ;;  %p3056_p2 = scmp.lt.s32.totalorder %s52_s12, %s52_s12 }
  0x28   :  { %p3052_p1 = scmp.ne.s32.totalorder %s52_s12, %s3051_s5  ;;  %p3057_p3 = scmp.lt.s32.totalorder %s3051_s5, %s3051_s5 }
  0x2a   :  { %p3058_p4 = por %p3057_p3, %p3056_p2 }
  0x2c   :  { %p3059_p5 = pnand %p3058_p4, %p3052_p1 }
  0x2e   :  { %3062 = shalt.err (!%p3059_p5)
}
  0x2f   :  { %57 = dma.hbm_to_vmem [thread:$0]  %s3472_s3, 1024, %s52_s12, [#allocation7], %s3134_s16, %s3134_s16, %s3135_s17  }
  0x30   :  { %s3071_s0 = scalar_lea.vmem %s78_s14, 1024  ;;  %p3076_p7 = scmp.lt.s32.totalorder %s78_s14, %s78_s14 }
  0x31   :  { %p3072_p6 = scmp.ne.s32.totalorder %s78_s14, %s3071_s0  ;;  %p3077_p8 = scmp.lt.s32.totalorder %s3071_s0, %s3071_s0 }
  0x33   :  { %p3078_p9 = por %p3077_p8, %p3076_p7 }
  0x35   :  { %p3079_p10 = pnand %p3078_p9, %p3072_p6 }
  0x37   :  { %3082 = shalt.err (!%p3079_p10)
}
  0x38   :  { %83 = dma.hbm_to_vmem [thread:$0]  %s3475_s6, 1024, %s78_s14, [#allocation10], %s3134_s16, %s3134_s16, %s3135_s17  }
  0x39   :  { %s3142_s21 = smov [#allocation12]  }
  0x3a   :  { %s91_s22 = sshll.u32 %s3142_s21, 4  ;;  %s92_s22 = int_to_ptr.vmem [resolvable:$true] %s91_s22 }
  0x3b   :  { %s3091_s23 = scalar_lea.vmem %s92_s22, 1024  ;;  %p3096_p12 = scmp.lt.s32.totalorder %s92_s22, %s92_s22 }
  0x3c   :  { %p3092_p11 = scmp.ne.s32.totalorder %s92_s22, %s3091_s23  ;;  %p3097_p13 = scmp.lt.s32.totalorder %s3091_s23, %s3091_s23 }
  0x3e   :  { %p3098_p0 = por %p3097_p13, %p3096_p12 }
  0x40   :  { %p3099_p1 = pnand %p3098_p0, %p3092_p11 }
  0x42   :  { %3102 = shalt.err (!%p3099_p1)
}
  0x43   :  { %97 = dma.hbm_to_vmem [thread:$0]  %s3477_s8, 1024, %s92_s22, [#allocation13], %s3134_s16, %s3134_s16, %s3135_s17  }
  0x44   :  { %3123 = dma.done.wait [#allocation4], 8192  }
  0x45   :  { %3124 = vsyncadd [#allocation4], 4294959104 }
  0x46   :  { %3125 = dma.done.wait [#allocation7], 9216  }
  0x47   :  { %3126 = vsyncadd [#allocation7], 4294958080 }
  0x48   :  { %3127 = dma.done.wait [#allocation10], 2048  }
  0x49   :  { %3128 = vsyncadd [#allocation10], 4294965248 }
  0x4a   :  { %3129 = dma.done.wait [#allocation13], 1024  }
  0x4b   :  { %3130 = vsyncadd [#allocation13], 4294966272  ;;  %v2887_v0 = vld [vmem:[#allocation6 + $0x78] sm:$0xff]   ;;  %v2891_v4 = vld [vmem:[#allocation6 + $0x70] sm:$0xff]  }
  0x4c   :  { %v2888_v1 = vld [vmem:[#allocation6 + $0xf8] sm:$0xff]   ;;  %2426 = vmatprep.subr.bf16.mxu0 %v2887_v0  ;;  %v2892_v5 = vld [vmem:[#allocation6 + $0xf0] sm:$0xff]   ;;  %v2895_v8 = vld [vmem:[#allocation6 + $0x68] sm:$0xff]  }
  0x4d   :  { %v2889_v2 = vld [vmem:[#allocation6 + $0x38] sm:$0xff]   ;;  %2490 = vmatprep.subr.bf16.mxu1 %v2888_v1  ;;  %v2893_v6 = vld [vmem:[#allocation6 + $0x30] sm:$0xff]   ;;  %v2896_v9 = vld [vmem:[#allocation6 + $0xe8] sm:$0xff]  }
  0x4e   :  { %v2890_v3 = vld [vmem:[#allocation6 + $0xb8] sm:$0xff]   ;;  %2427 = vmatpush3.bf16.msra.mxu0 %v2889_v2  ;;  %v2894_v7 = vld [vmem:[#allocation6 + $0xb0] sm:$0xff]   ;;  %v2897_v10 = vld [vmem:[#allocation6 + $0x28] sm:$0xff]  }
  0x4f   :  { %2491 = vmatpush3.bf16.msra.mxu1 %v2890_v3  ;;  %2428 = vmatprep.subr.bf16.mxu0 %v2891_v4  ;;  %v2898_v11 = vld [vmem:[#allocation6 + $0xa8] sm:$0xff]   ;;  %v2899_v12 = vld [vmem:[#allocation6 + $0x60] sm:$0xff]   ;;  %v2903_v16 = vld [vmem:[#allocation6 + $0x58] sm:$0xff]  }
  0x50   :  { %2492 = vmatprep.subr.bf16.mxu1 %v2892_v5  ;;  %v2900_v13 = vld [vmem:[#allocation6 + $0xe0] sm:$0xff]   ;;  %v2904_v17 = vld [vmem:[#allocation6 + $0xd8] sm:$0xff]   ;;  %v2907_v20 = vld [vmem:[#allocation6 + $0x50] sm:$0xff]  }
  0x51   :  { %v2901_v14 = vld [vmem:[#allocation6 + $0x20] sm:$0xff]   ;;  %v2905_v18 = vld [vmem:[#allocation6 + $0x18] sm:$0xff]   ;;  %v2908_v21 = vld [vmem:[#allocation6 + $0xd0] sm:$0xff]  }
  0x52   :  { %2429 = vmatpush3.bf16.msra.mxu0 %v2893_v6  ;;  %v2902_v15 = vld [vmem:[#allocation6 + $0xa0] sm:$0xff]   ;;  %v2906_v19 = vld [vmem:[#allocation6 + $0x98] sm:$0xff]   ;;  %v2909_v22 = vld [vmem:[#allocation6 + $0x10] sm:$0xff]  }
  0x53   :  { %2493 = vmatpush3.bf16.msra.mxu1 %v2894_v7  ;;  %2430 = vmatprep.subr.bf16.mxu0 %v2895_v8  ;;  %v2910_v23 = vld [vmem:[#allocation6 + $0x90] sm:$0xff]   ;;  %v2911_v24 = vld [vmem:[#allocation6 + $0x48] sm:$0xff]   ;;  %v2915_v28 = vld [vmem:[#allocation6 + $0x40] sm:$0xff]  }
  0x54   :  { %2494 = vmatprep.subr.bf16.mxu1 %v2896_v9  ;;  %v2912_v25 = vld [vmem:[#allocation6 + $0xc8] sm:$0xff]   ;;  %v2916_v29 = vld [vmem:[#allocation6 + $0xc0] sm:$0xff]   ;;  %v2919_v40 = vld [vmem:[#allocation6 + $0x178] sm:$0xff]  }
  0x55   :  { %v2913_v26 = vld [vmem:[#allocation6 + $0x8] sm:$0xff]   ;;  %v2917_v30 = vld [vmem:[#allocation6] sm:$0xff]   ;;  %v2920_v41 = vld [vmem:[#allocation6 + $0x138] sm:$0xff]  }
  0x56   :  { %2431 = vmatpush3.bf16.msra.mxu0 %v2897_v10  ;;  %v2914_v27 = vld [vmem:[#allocation6 + $0x88] sm:$0xff]   ;;  %v2918_v31 = vld [vmem:[#allocation6 + $0x80] sm:$0xff]   ;;  %v2921_v42 = vld [vmem:[#allocation6 + $0x1f8] sm:$0xff]  }
  0x57   :  { %2495 = vmatpush3.bf16.msra.mxu1 %v2898_v11  ;;  %2432 = vmatprep.subr.bf16.mxu0 %v2899_v12  ;;  %v162_v32 = vld [vmem:[#allocation3] sm:$0xff]  ;;  %v163_v34 = vld [vmem:[#allocation3 + $0x8] sm:$0xff]  ;;  %v2922_v43 = vld [vmem:[#allocation6 + $0x1b8] sm:$0xff]  }
  0x58   :  { %2496 = vmatprep.subr.bf16.mxu1 %v2900_v13  ;;  %v166_v33 = vld [vmem:[#allocation3 + $0x20] sm:$0xff]  ;;  %v167_v37 = vld [vmem:[#allocation3 + $0x28] sm:$0xff]  ;;  %v2923_v50 = vld [vmem:[#allocation6 + $0x170] sm:$0xff]  }
  0x59   :  { %v2263_v35 = vcombine.low %v162_v32, %v166_v33  ;;  %v2264_v36 = vcombine.high %v162_v32, %v166_v33  ;;  %v2265_v38 = vcombine.low %v163_v34, %v167_v37  ;;  %v2266_v39 = vcombine.high %v163_v34, %v167_v37  ;;  %v170_v44 = vld [vmem:[#allocation3 + $0x40] sm:$0xff]  ;;  %v171_v47 = vld [vmem:[#allocation3 + $0x48] sm:$0xff]  ;;  %v2924_v52 = vld [vmem:[#allocation6 + $0x130] sm:$0xff]  }
  0x5a   :  { %2433 = vmatpush3.bf16.msra.mxu0 %v2901_v14  ;;  %v174_v45 = vld [vmem:[#allocation3 + $0x60] sm:$0xff]  ;;  %v175_v48 = vld [vmem:[#allocation3 + $0x68] sm:$0xff]  ;;  %v2925_v54 = vld [vmem:[#allocation6 + $0x1f0] sm:$0xff]  }
  0x5b   :  { %2497 = vmatpush3.bf16.msra.mxu1 %v2902_v15  ;;  %2434 = vmatprep.subr.bf16.mxu0 %v2903_v16  ;;  %v2272_v46 = vcombine.high %v170_v44, %v174_v45  ;;  %v2274_v49 = vcombine.high %v171_v47, %v175_v48  ;;  %v2271_v51 = vcombine.low %v170_v44, %v174_v45  ;;  %v2926_v55 = vld [vmem:[#allocation6 + $0x1b0] sm:$0xff]   ;;  %v178_v56 = vld [vmem:[#allocation3 + $0x80] sm:$0xff]  ;;  %v179_v58 = vld [vmem:[#allocation3 + $0x88] sm:$0xff] }
  0x5c   :  { %2498 = vmatprep.subr.bf16.mxu1 %v2904_v17  ;;  %1090 = vmatprep.mubr.bf16.mxu0 %v2264_v36  ;;  %v2273_v53 = vcombine.low %v171_v47, %v175_v48  ;;  %v182_v57 = vld [vmem:[#allocation3 + $0xa0] sm:$0xff]  ;;  %v183_v59 = vld [vmem:[#allocation3 + $0xa8] sm:$0xff]  ;;  %v2941_v32 = vld [vmem:[#allocation6 + $0x1d0] sm:$0xff]  }
  0x5d   :  { %1187 = vmatprep.mubr.bf16.mxu1 %v2266_v39  ;;  %v2280_v60 = vcombine.high %v178_v56, %v182_v57  ;;  %v2282_v61 = vcombine.high %v179_v58, %v183_v59  ;;  %v2927_v62 = vld [vmem:[#allocation6 + $0x168] sm:$0xff]   ;;  %v2279_v2 = vcombine.low %v178_v56, %v182_v57  ;;  %v186_v3 = vld [vmem:[#allocation3 + $0xc0] sm:$0xff]  ;;  %v2281_v6 = vcombine.low %v179_v58, %v183_v59  ;;  %v2942_v33 = vld [vmem:[#allocation6 + $0x190] sm:$0xff]  }
  0x5e   :  { %2435 = vmatpush3.bf16.msra.mxu0 %v2905_v18  ;;  %v2928_v63 = vld [vmem:[#allocation6 + $0x128] sm:$0xff]   ;;  %v190_v4 = vld [vmem:[#allocation3 + $0xe0] sm:$0xff]  ;;  %v2935_v18 = vld [vmem:[#allocation6 + $0x158] sm:$0xff]  }
  0x5f   :  { %2499 = vmatpush3.bf16.msra.mxu1 %v2906_v19  ;;  %2436 = vmatprep.subr.bf16.mxu0 %v2907_v20  ;;  %v2929_v0 = vld [vmem:[#allocation6 + $0x1e8] sm:$0xff]   ;;  %v2288_v7 = vcombine.high %v186_v3, %v190_v4  ;;  %v2931_v10 = vld [vmem:[#allocation6 + $0x160] sm:$0xff]   ;;  %v2287_v19 = vcombine.low %v186_v3, %v190_v4  ;;  %v2936_v20 = vld [vmem:[#allocation6 + $0x118] sm:$0xff]  }
  0x60   :  { %2500 = vmatprep.subr.bf16.mxu1 %v2908_v21  ;;  %v2930_v1 = vld [vmem:[#allocation6 + $0x1a8] sm:$0xff]   ;;  %v2932_v11 = vld [vmem:[#allocation6 + $0x120] sm:$0xff]  }
  0x61   :  { %v187_v5 = vld [vmem:[#allocation3 + $0xc8] sm:$0xff]  ;;  %v2933_v12 = vld [vmem:[#allocation6 + $0x1e0] sm:$0xff]  }
  0x62   :  { %2437 = vmatpush3.bf16.msra.mxu0 %v2909_v22  ;;  %v191_v8 = vld [vmem:[#allocation3 + $0xe8] sm:$0xff]  ;;  %v2934_v13 = vld [vmem:[#allocation6 + $0x1a0] sm:$0xff]  }
  0x63   :  { %2501 = vmatpush3.bf16.msra.mxu1 %v2910_v23  ;;  %2438 = vmatprep.subr.bf16.mxu0 %v2911_v24  ;;  %v2290_v9 = vcombine.high %v187_v5, %v191_v8  ;;  %v194_v14 = vld [vmem:[#allocation3 + $0x100] sm:$0xff]  ;;  %v195_v16 = vld [vmem:[#allocation3 + $0x108] sm:$0xff]  ;;  %v2289_v21 = vcombine.low %v187_v5, %v191_v8  ;;  %v2937_v23 = vld [vmem:[#allocation6 + $0x1d8] sm:$0xff]  }
  0x64   :  { %2502 = vmatprep.subr.bf16.mxu1 %v2912_v25  ;;  %v198_v15 = vld [vmem:[#allocation3 + $0x120] sm:$0xff]  ;;  %v199_v17 = vld [vmem:[#allocation3 + $0x128] sm:$0xff]  ;;  %v2938_v25 = vld [vmem:[#allocation6 + $0x198] sm:$0xff]  }
  0x65   :  { %v2296_v22 = vcombine.high %v194_v14, %v198_v15  ;;  %v2298_v24 = vcombine.high %v195_v16, %v199_v17  ;;  %v2295_v34 = vcombine.low %v194_v14, %v198_v15  ;;  %v2944_v39 = vld [vmem:[#allocation6 + $0x108] sm:$0xff]   ;;  %v2948_v48 = vld [vmem:[#allocation6 + $0x100] sm:$0xff]   ;;  %v176_v8 = vld [vmem:[#allocation3 + $0x70] sm:$0xff] }
  0x66   :  { %2439 = vmatpush3.bf16.msra.mxu0 %v2913_v26  ;;  %v202_v26 = vld [vmem:[#allocation3 + $0x140] sm:$0xff]  ;;  %v211_v44 = vld [vmem:[#allocation3 + $0x188] sm:$0xff]  ;;  %v2952_v15 = vld [vmem:[#allocation11 + $0x30] sm:$0xff]  }
  0x67   :  { %2503 = vmatpush3.bf16.msra.mxu1 %v2914_v27  ;;  %2440 = vmatprep.subr.bf16.mxu0 %v2915_v28  ;;  %v206_v27 = vld [vmem:[#allocation3 + $0x160] sm:$0xff]  ;;  %v2939_v28 = vld [vmem:[#allocation6 + $0x150] sm:$0xff]   ;;  %v215_v45 = vld [vmem:[#allocation3 + $0x1a8] sm:$0xff] }
  0x68   :  { %2504 = vmatprep.subr.bf16.mxu1 %v2916_v29  ;;  %v203_v29 = vld [vmem:[#allocation3 + $0x148] sm:$0xff]  ;;  %v2304_v36 = vcombine.high %v202_v26, %v206_v27  ;;  %v2303_v47 = vcombine.low %v202_v26, %v206_v27  ;;  %v222_v56 = vld [vmem:[#allocation3 + $0x1e0] sm:$0xff]  ;;  %v188_v26 = vld [vmem:[#allocation3 + $0xd0] sm:$0xff] }
  0x69   :  { %v219_v57 = vld [vmem:[#allocation3 + $0x1c8] sm:$0xff]  ;;  %v192_v27 = vld [vmem:[#allocation3 + $0xf0] sm:$0xff] }
  0x6a   :  { %2441 = vmatpush3.bf16.msra.mxu0 %v2917_v30  ;;  %v207_v30 = vld [vmem:[#allocation3 + $0x168] sm:$0xff] }
  0x6b   :  { %2505 = vmatpush3.bf16.msra.mxu1 %v2918_v31  ;;  %2554 = vmatprep.subr.bf16.mxu0 %v2919_v40  ;;  %v2940_v31 = vld [vmem:[#allocation6 + $0x110] sm:$0xff]   ;;  %v2306_v37 = vcombine.high %v203_v29, %v207_v30  ;;  %v2945_v40 = vld [vmem:[#allocation6 + $0x1c8] sm:$0xff]  }
  0x6c   :  { %2618 = vmatprep.subr.bf16.mxu1 %v2921_v42  ;;  %v214_v42 = vld [vmem:[#allocation3 + $0x1a0] sm:$0xff]  ;;  %v223_v58 = vld [vmem:[#allocation3 + $0x1e8] sm:$0xff] }
  0x6d   :  { %1091 = vmatmul.mubr.bf16.vlgmr.msra.gmra.mxu0 %v2263_v35  ;;  %v2297_v35 = vcombine.low %v195_v16, %v199_v17  ;;  %v2321_v4 = vcombine.low %v219_v57, %v223_v58  ;;  %v180_v16 = vld [vmem:[#allocation3 + $0x90] sm:$0xff] }
  0x6e   :  { %1188 = vmatmul.mubr.bf16.vlgmr.msra.gmra.mxu1 %v2265_v38  ;;  %2555 = vmatpush3.bf16.msra.mxu0 %v2920_v41  ;;  %v2943_v38 = vld [vmem:[#allocation6 + $0x148] sm:$0xff]   ;;  %v210_v41 = vld [vmem:[#allocation3 + $0x180] sm:$0xff]  ;;  %v184_v17 = vld [vmem:[#allocation3 + $0xb0] sm:$0xff] }
  0x6f   :  { %2619 = vmatpush3.bf16.msra.mxu1 %v2922_v43  ;;  %1098 = vmatprep.mubr.bf16.mxu0 %v2272_v46  ;;  %v2946_v43 = vld [vmem:[#allocation6 + $0x188] sm:$0xff]   ;;  %v2947_v46 = vld [vmem:[#allocation6 + $0x140] sm:$0xff]   ;;  %v2311_v59 = vcombine.low %v210_v41, %v214_v42 }
  0x70   :  { %1195 = vmatprep.mubr.bf16.mxu1 %v2274_v49  ;;  %2556 = vmatprep.subr.bf16.mxu0 %v2923_v50  ;;  %v2305_v49 = vcombine.low %v203_v29, %v207_v30  ;;  %v2312_v50 = vcombine.high %v210_v41, %v214_v42  ;;  %v193_v29 = vld [vmem:[#allocation3 + $0xf8] sm:$0xff]  ;;  %v2291_v41 = vcombine.low %v188_v26, %v192_v27 }
  0x71   :  { %2620 = vmatprep.subr.bf16.mxu1 %v2925_v54  ;;  %v2951_v54 = vld [vmem:[#allocation11 + $0x38] sm:$0xff]  }
  0x72   :  { %2557 = vmatpush3.bf16.msra.mxu0 %v2924_v52  ;;  %v2314_v52 = vcombine.high %v211_v44, %v215_v45  ;;  %v2955_v30 = vld [vmem:[#allocation11 + $0x18] sm:$0xff]  }
  0x73   :  { %2621 = vmatpush3.bf16.msra.mxu1 %v2926_v55  ;;  %2558 = vmatprep.subr.bf16.mxu0 %v2927_v62  ;;  %v218_v55 = vld [vmem:[#allocation3 + $0x1c0] sm:$0xff]  ;;  %v2322_v62 = vcombine.high %v219_v57, %v223_v58  ;;  %v217_v57 = vld [vmem:[#allocation3 + $0x1b8] sm:$0xff] }
  0x74   :  { %2622 = vmatprep.subr.bf16.mxu1 %v2929_v0  ;;  %v168_v0 = vld [vmem:[#allocation3 + $0x30] sm:$0xff]  ;;  %v2319_v3 = vcombine.low %v218_v55, %v222_v56 }
  0x75   :  { %1099 = vmatmul.mubr.bf16.gmra.mxu0 %v2271_v51  ;;  %v2949_v51 = vld [vmem:[#allocation6 + $0x1c0] sm:$0xff]  }
  0x76   :  { %1196 = vmatmul.mubr.bf16.gmra.mxu1 %v2273_v53  ;;  %1106 = vmatprep.mubr.bf16.mxu0 %v2280_v60  ;;  %v2950_v53 = vld [vmem:[#allocation6 + $0x180] sm:$0xff]   ;;  %v2313_v60 = vcombine.low %v211_v44, %v215_v45 }
  0x77   :  { %1203 = vmatprep.mubr.bf16.mxu1 %v2282_v61  ;;  %2559 = vmatpush3.bf16.msra.mxu0 %v2928_v63  ;;  %v2320_v61 = vcombine.high %v218_v55, %v222_v56  ;;  %v164_v63 = vld [vmem:[#allocation3 + $0x10] sm:$0xff]  ;;  %v2958_v45 = vld [vmem:[#allocation11] sm:$0xff]   ;;  %v213_v56 = vld [vmem:[#allocation3 + $0x198] sm:$0xff] }
  0x78   :  { %2623 = vmatpush3.bf16.msra.mxu1 %v2930_v1  ;;  %2560 = vmatprep.subr.bf16.mxu0 %v2931_v10  ;;  %v165_v1 = vld [vmem:[#allocation3 + $0x18] sm:$0xff]  ;;  %v2268_v5 = vcombine.high %v164_v63, %v168_v0  ;;  %v216_v55 = vld [vmem:[#allocation3 + $0x1b0] sm:$0xff] }
  0x79   :  { %2624 = vmatprep.subr.bf16.mxu1 %v2933_v12  ;;  %v177_v10 = vld [vmem:[#allocation3 + $0x78] sm:$0xff] }
  0x7b   :  { %2561 = vmatpush3.bf16.msra.mxu0 %v2932_v11  ;;  %v2267_v11 = vcombine.low %v164_v63, %v168_v0  ;;  %v224_v63 = vld [vmem:[#allocation3 + $0x1f0] sm:$0xff]  ;;  %v221_v0 = vld [vmem:[#allocation3 + $0x1d8] sm:$0xff] }
  0x7c   :  { %2625 = vmatpush3.bf16.msra.mxu1 %v2934_v13  ;;  %2562 = vmatprep.subr.bf16.mxu0 %v2935_v18  ;;  %v181_v18 = vld [vmem:[#allocation3 + $0x98] sm:$0xff] }
  0x7d   :  { %1107 = vmatmul.mubr.bf16.gmra.mxu0 %v2279_v2  ;;  %2626 = vmatprep.subr.bf16.mxu1 %v2937_v23  ;;  %v169_v2 = vld [vmem:[#allocation3 + $0x38] sm:$0xff]  ;;  %v2284_v23 = vcombine.high %v180_v16, %v184_v17 }
  0x7e   :  { %1204 = vmatmul.mubr.bf16.gmra.mxu1 %v2281_v6  ;;  %1114 = vmatprep.mubr.bf16.mxu0 %v2288_v7  ;;  %v2270_v6 = vcombine.high %v165_v1, %v169_v2  ;;  %v172_v7 = vld [vmem:[#allocation3 + $0x50] sm:$0xff]  ;;  %v2269_v12 = vcombine.low %v165_v1, %v169_v2  ;;  %v225_v1 = vld [vmem:[#allocation3 + $0x1f8] sm:$0xff] }
  0x7f   :  { %1211 = vmatprep.mubr.bf16.mxu1 %v2290_v9  ;;  %2563 = vmatpush3.bf16.msra.mxu0 %v2936_v20  ;;  %v173_v9 = vld [vmem:[#allocation3 + $0x58] sm:$0xff]  ;;  %v2276_v13 = vcombine.high %v172_v7, %v176_v8  ;;  %v2953_v20 = vld [vmem:[#allocation11 + $0x28] sm:$0xff]  }
  0x80   :  { %2627 = vmatpush3.bf16.msra.mxu1 %v2938_v25  ;;  %2564 = vmatprep.subr.bf16.mxu0 %v2939_v28  ;;  %v2278_v14 = vcombine.high %v173_v9, %v177_v10  ;;  %v189_v28 = vld [vmem:[#allocation3 + $0xd8] sm:$0xff] }
  0x81   :  { %2628 = vmatprep.subr.bf16.mxu1 %v2941_v32  ;;  %v2293_v42 = vcombine.low %v189_v28, %v193_v29 }
  0x83   :  { %2565 = vmatpush3.bf16.msra.mxu0 %v2940_v31  ;;  %v2283_v31 = vcombine.low %v180_v16, %v184_v17  ;;  %v2970_v16 = vld [vmem:[#allocation8 + $0x20] sm:$0xff]   ;;  %v2971_v17 = vld [vmem:[#allocation8 + $0x18] sm:$0xff]  }
  0x84   :  { %2629 = vmatpush3.bf16.msra.mxu1 %v2942_v33  ;;  %2566 = vmatprep.subr.bf16.mxu0 %v2943_v38  ;;  %v2292_v33 = vcombine.high %v188_v26, %v192_v27  ;;  %v197_v38 = vld [vmem:[#allocation3 + $0x118] sm:$0xff] }
  0x85   :  { %1115 = vmatmul.mubr.bf16.gmra.mxu0 %v2287_v19  ;;  %2630 = vmatprep.subr.bf16.mxu1 %v2945_v40  ;;  %v185_v19 = vld [vmem:[#allocation3 + $0xb8] sm:$0xff]  ;;  %v2957_v40 = vld [vmem:[#allocation11 + $0x8] sm:$0xff]  }
  0x86   :  { %1212 = vmatmul.mubr.bf16.gmra.mxu1 %v2289_v21  ;;  %1122 = vmatprep.mubr.bf16.mxu0 %v2296_v22  ;;  %v2275_v21 = vcombine.low %v172_v7, %v176_v8  ;;  %v2277_v22 = vcombine.low %v173_v9, %v177_v10  ;;  %v2286_v25 = vcombine.high %v181_v18, %v185_v19  ;;  %v2959_v8 = vld [vmem:[#allocation9] sm:$0xff]   ;;  %v2967_v9 = vld [vmem:[#allocation8 + $0x38] sm:$0xff]   ;;  %v2960_v10 = vld [vmem:[#allocation9 + $0x8] sm:$0xff]  }
  0x87   :  { %1219 = vmatprep.mubr.bf16.mxu1 %v2298_v24  ;;  %2567 = vmatpush3.bf16.msra.mxu0 %v2944_v39  ;;  %v2954_v24 = vld [vmem:[#allocation11 + $0x20] sm:$0xff]   ;;  %v2285_v32 = vcombine.low %v181_v18, %v185_v19  ;;  %v201_v39 = vld [vmem:[#allocation3 + $0x138] sm:$0xff]  ;;  %v2325_v7 = vcombine.low %v221_v0, %v225_v1  ;;  %v2964_v18 = vld [vmem:[#allocation9 + $0x28] sm:$0xff]  }
  0x88   :  { %2631 = vmatpush3.bf16.msra.mxu1 %v2946_v43  ;;  %2568 = vmatprep.subr.bf16.mxu0 %v2947_v46  ;;  %v2302_v44 = vcombine.high %v197_v38, %v201_v39  ;;  %v204_v46 = vld [vmem:[#allocation3 + $0x150] sm:$0xff] }
  0x89   :  { %2632 = vmatprep.subr.bf16.mxu1 %v2949_v51  ;;  %v2301_v51 = vcombine.low %v197_v38, %v201_v39  ;;  %v2965_v19 = vld [vmem:[#allocation9 + $0x30] sm:$0xff]  }
  0x8b   :  { %2569 = vmatpush3.bf16.msra.mxu0 %v2948_v48  ;;  %v205_v48 = vld [vmem:[#allocation3 + $0x158] sm:$0xff] }
  0x8c   :  { %2633 = vmatpush3.bf16.msra.mxu1 %v2950_v53  ;;  %2746 = vmatprep.subr.bf16.mxu0 %v2967_v9 }
  0x8d   :  { %1123 = vmatmul.mubr.bf16.gmra.mxu0 %v2295_v34  ;;  %2778 = vmatprep.subr.bf16.mxu1 %v2951_v54  ;;  %v2294_v34 = vcombine.high %v189_v28, %v193_v29 }
  0x8e   :  { %1220 = vmatmul.mubr.bf16.gmra.mxu1 %v2297_v35  ;;  %1130 = vmatprep.mubr.bf16.mxu0 %v2304_v36  ;;  %v2956_v35 = vld [vmem:[#allocation11 + $0x10] sm:$0xff]  }
  0x8f   :  { %1227 = vmatprep.mubr.bf16.mxu1 %v2306_v37  ;;  %v196_v36 = vld [vmem:[#allocation3 + $0x110] sm:$0xff] }
  0x90   :  { %v200_v37 = vld [vmem:[#allocation3 + $0x130] sm:$0xff] }
  0x91   :  { %v2300_v43 = vcombine.high %v196_v36, %v200_v37 }
  0x95   :  { %1131 = vmatmul.mubr.bf16.gmra.mxu0 %v2303_v47  ;;  %v208_v47 = vld [vmem:[#allocation3 + $0x170] sm:$0xff] }
  0x96   :  { %1228 = vmatmul.mubr.bf16.gmra.mxu1 %v2305_v49  ;;  %1138 = vmatprep.mubr.bf16.mxu0 %v2312_v50  ;;  %v209_v49 = vld [vmem:[#allocation3 + $0x178] sm:$0xff]  ;;  %v2299_v50 = vcombine.low %v196_v36, %v200_v37  ;;  %v2307_v58 = vcombine.low %v204_v46, %v208_v47 }
  0x97   :  { %1235 = vmatprep.mubr.bf16.mxu1 %v2314_v52  ;;  %v2308_v52 = vcombine.high %v204_v46, %v208_v47  ;;  %v2310_v53 = vcombine.high %v205_v48, %v209_v49 }
  0x9d   :  { %1139 = vmatmul.mubr.bf16.gmra.mxu0 %v2311_v59  ;;  %v2309_v59 = vcombine.low %v205_v48, %v209_v49 }
  0x9e   :  { %1236 = vmatmul.mubr.bf16.gmra.mxu1 %v2313_v60  ;;  %1146 = vmatprep.mubr.bf16.mxu0 %v2320_v61  ;;  %v2318_v61 = vcombine.high %v213_v56, %v217_v57 }
  0x9f   :  { %1243 = vmatprep.mubr.bf16.mxu1 %v2322_v62  ;;  %v220_v62 = vld [vmem:[#allocation3 + $0x1d0] sm:$0xff] }
  0xa5   :  { %1147 = vmatmul.mubr.bf16.gmra.mxu0 %v2319_v3  ;;  %v2317_v3 = vcombine.low %v213_v56, %v217_v57 }
  0xa6   :  { %1244 = vmatmul.mubr.bf16.gmra.mxu1 %v2321_v4  ;;  %1284 = vmatprep.mubr.bf16.mxu0 %v2268_v5  ;;  %v2324_v4 = vcombine.high %v220_v62, %v224_v63  ;;  %v2326_v5 = vcombine.high %v221_v0, %v225_v1 }
  0xa7   :  { %1381 = vmatprep.mubr.bf16.mxu1 %v2270_v6  ;;  %v2323_v6 = vcombine.low %v220_v62, %v224_v63 }
  0xad   :  { %1285 = vmatmul.mubr.bf16.vlgmr.msra.gmra.mxu0 %v2267_v11  ;;  %v2961_v11 = vld [vmem:[#allocation9 + $0x10] sm:$0xff]  }
  0xae   :  { %1382 = vmatmul.mubr.bf16.vlgmr.msra.gmra.mxu1 %v2269_v12  ;;  %1292 = vmatprep.mubr.bf16.mxu0 %v2276_v13  ;;  %v2968_v12 = vld [vmem:[#allocation8 + $0x30] sm:$0xff]   ;;  %v2969_v13 = vld [vmem:[#allocation8 + $0x28] sm:$0xff]  }
  0xaf   :  { %2779 = vmatpush3.bf16.msra.mxu1 %v2951_v54  ;;  %1389 = vmatprep.mubr.bf16.mxu1 %v2278_v14  ;;  %v212_v54 = vld [vmem:[#allocation3 + $0x190] sm:$0xff]  ;;  %v2962_v14 = vld [vmem:[#allocation9 + $0x18] sm:$0xff]  }
  0xb0   :  { %2780 = vmatprep.subr.bf16.mxu1 %v2952_v15  ;;  %v2316_v60 = vcombine.high %v212_v54, %v216_v55  ;;  %v2315_v2 = vcombine.low %v212_v54, %v216_v55  ;;  %2747 = vmatpush3.bf16.msra.mxu0 %v2967_v9 }
  0xb1   :  { %2748 = vmatprep.subr.bf16.mxu0 %v2968_v12 }
  0xb3   :  { %2781 = vmatpush3.bf16.msra.mxu1 %v2952_v15  ;;  %v2963_v15 = vld [vmem:[#allocation9 + $0x20] sm:$0xff]  }
  0xb4   :  { %2782 = vmatprep.subr.bf16.mxu1 %v2953_v20  ;;  %2749 = vmatpush3.bf16.msra.mxu0 %v2968_v12 }
  0xb5   :  { %1293 = vmatmul.mubr.bf16.gmra.mxu0 %v2275_v21  ;;  %2750 = vmatprep.subr.bf16.mxu0 %v2969_v13  ;;  %v2973_v21 = vld [vmem:[#allocation8 + $0x8] sm:$0xff]  }
  0xb6   :  { %1390 = vmatmul.mubr.bf16.gmra.mxu1 %v2277_v22  ;;  %1300 = vmatprep.mubr.bf16.mxu0 %v2284_v23  ;;  %v2966_v22 = vld [vmem:[#allocation9 + $0x38] sm:$0xff]   ;;  %v2974_v23 = vld [vmem:[#allocation8] sm:$0xff]  }
  0xb7   :  { %1397 = vmatprep.mubr.bf16.mxu1 %v2286_v25  ;;  %2783 = vmatpush3.bf16.msra.mxu1 %v2953_v20  ;;  %v2972_v20 = vld [vmem:[#allocation8 + $0x10] sm:$0xff]  }
  0xb8   :  { %2784 = vmatprep.subr.bf16.mxu1 %v2954_v24  ;;  %2751 = vmatpush3.bf16.msra.mxu0 %v2969_v13 }
  0xb9   :  { %2752 = vmatprep.subr.bf16.mxu0 %v2970_v16 }
  0xbb   :  { %2785 = vmatpush3.bf16.msra.mxu1 %v2954_v24  ;;  %v3234_v24 = vld [vmem:[#allocation12 + $0x38] sm:$0xff]  }
  0xbc   :  { %2786 = vmatprep.subr.bf16.mxu1 %v2955_v30  ;;  %2753 = vmatpush3.bf16.msra.mxu0 %v2970_v16 }
  0xbd   :  { %1301 = vmatmul.mubr.bf16.gmra.mxu0 %v2283_v31  ;;  %2754 = vmatprep.subr.bf16.mxu0 %v2971_v17 }
  0xbe   :  { %1398 = vmatmul.mubr.bf16.gmra.mxu1 %v2285_v32  ;;  %1308 = vmatprep.mubr.bf16.mxu0 %v2292_v33 }
  0xbf   :  { %1405 = vmatprep.mubr.bf16.mxu1 %v2294_v34  ;;  %2787 = vmatpush3.bf16.msra.mxu1 %v2955_v30 }
  0xc0   :  { %2788 = vmatprep.subr.bf16.mxu1 %v2956_v35  ;;  %2755 = vmatpush3.bf16.msra.mxu0 %v2971_v17 }
  0xc1   :  { %2756 = vmatprep.subr.bf16.mxu0 %v2972_v20 }
  0xc3   :  { %2789 = vmatpush3.bf16.msra.mxu1 %v2956_v35 }
  0xc4   :  { %2790 = vmatprep.subr.bf16.mxu1 %v2957_v40  ;;  %2757 = vmatpush3.bf16.msra.mxu0 %v2972_v20 }
  0xc5   :  { %1309 = vmatmul.mubr.bf16.gmra.mxu0 %v2291_v41  ;;  %2758 = vmatprep.subr.bf16.mxu0 %v2973_v21 }
  0xc6   :  { %1406 = vmatmul.mubr.bf16.gmra.mxu1 %v2293_v42  ;;  %1316 = vmatprep.mubr.bf16.mxu0 %v2300_v43 }
  0xc7   :  { %1413 = vmatprep.mubr.bf16.mxu1 %v2302_v44  ;;  %2791 = vmatpush3.bf16.msra.mxu1 %v2957_v40 }
  0xc8   :  { %2792 = vmatprep.subr.bf16.mxu1 %v2958_v45  ;;  %2759 = vmatpush3.bf16.msra.mxu0 %v2973_v21 }
  0xc9   :  { %2760 = vmatprep.subr.bf16.mxu0 %v2974_v23 }
  0xcb   :  { %2793 = vmatpush3.bf16.msra.mxu1 %v2958_v45 }
  0xcc   :  { %2761 = vmatpush3.bf16.msra.mxu0 %v2974_v23 }
  0xcd   :  { %1317 = vmatmul.mubr.bf16.gmra.mxu0 %v2299_v50  ;;  %2810 = vmatprep.subr.bf16.mxu0 %v3234_v24 }
  0xce   :  { %1414 = vmatmul.mubr.bf16.gmra.mxu1 %v2301_v51  ;;  %1324 = vmatprep.mubr.bf16.mxu0 %v2308_v52 }
  0xcf   :  { %1421 = vmatprep.mubr.bf16.mxu1 %v2310_v53 }
  0xd5   :  { %1325 = vmatmul.mubr.bf16.gmra.mxu0 %v2307_v58 }
  0xd6   :  { %1422 = vmatmul.mubr.bf16.gmra.mxu1 %v2309_v59  ;;  %1332 = vmatprep.mubr.bf16.mxu0 %v2316_v60 }
  0xd7   :  { %1429 = vmatprep.mubr.bf16.mxu1 %v2318_v61 }
  0xdd   :  { %1333 = vmatmul.mubr.bf16.gmra.mxu0 %v2315_v2 }
  0xde   :  { %1430 = vmatmul.mubr.bf16.gmra.mxu1 %v2317_v3  ;;  %1340 = vmatprep.mubr.bf16.mxu0 %v2324_v4 }
  0xdf   :  { %1437 = vmatprep.mubr.bf16.mxu1 %v2326_v5 }
  0xe5   :  { %1341 = vmatmul.mubr.bf16.gmra.mxu0 %v2323_v6 }
  0xe6   :  { %1438 = vmatmul.mubr.bf16.gmra.mxu1 %v2325_v7 }
  0xe7   :  { %2794 = vmatprep.mubr.bf16.mxu1 %v2959_v8 }
  0xee   :  { %2795 = vmatmul.mubr.bf16.vlgmr.msra.gmra.mxu1 %v2960_v10 }
  0xef   :  { %2798 = vmatprep.mubr.bf16.mxu1 %v2961_v11 }
  0xf6   :  { %2799 = vmatmul.mubr.bf16.gmra.mxu1 %v2962_v14 }
  0xf7   :  { %2802 = vmatprep.mubr.bf16.mxu1 %v2963_v15 }
  0xfe   :  { %2803 = vmatmul.mubr.bf16.gmra.mxu1 %v2964_v18 }
  0xff   :  { %2806 = vmatprep.mubr.bf16.mxu1 %v2965_v19 }
 0x106   :  { %2807 = vmatmul.mubr.bf16.gmra.mxu1 %v2966_v22 }
 0x12d   :  { %v2442_v25 = vpop.f32.mrf.mxu0 }
 0x12e   :  { %v2506_v26 = vpop.f32.mrf.mxu1 }
 0x12f   :  { %v2443_v27 = vpop.f32.mrf.mxu0 }
 0x130   :  { %v2444_v28 = vadd.f32 %v2443_v27, %v2442_v25  ;;  %v2507_v29 = vpop.f32.mrf.mxu1 }
 0x131   :  { %v2508_v30 = vadd.f32 %v2507_v29, %v2506_v26  ;;  %v3237_v31 = vpop.f32.mrf.mxu0 }
 0x132   :  { %v3239_v32 = vpop.f32.mrf.mxu1 }
 0x133   :  { %v3241_v33 = vadd.f32 %v2508_v30, %v2444_v28  ;;  %v3243_v34 = vpop.f32.mrf.mxu0 }
 0x134   :  { %v3245_v35 = vpop.f32.mrf.mxu1 }
 0x135   :  { %v2448_v36 = vpop.f32.mrf.mxu0 }
 0x136   :  { %v2512_v37 = vpop.f32.mrf.mxu1 }
 0x137   :  { %v2449_v38 = vpop.f32.mrf.mxu0 }
 0x138   :  { %v2450_v39 = vadd.f32 %v2449_v38, %v2448_v36  ;;  %v2513_v40 = vpop.f32.mrf.mxu1 }
 0x139   :  { %v2514_v41 = vadd.f32 %v2513_v40, %v2512_v37  ;;  %v3247_v42 = vpop.f32.mrf.mxu0 }
 0x13a   :  { %v3249_v43 = vpop.f32.mrf.mxu1 }
 0x13b   :  { %v3251_v44 = vadd.f32 %v2514_v41, %v2450_v39  ;;  %v3253_v45 = vpop.f32.mrf.mxu0 }
 0x13c   :  { %v3255_v46 = vpop.f32.mrf.mxu1 }
 0x13d   :  { %v2454_v47 = vpop.f32.mrf.mxu0 }
 0x13e   :  { %v2518_v48 = vpop.f32.mrf.mxu1 }
 0x13f   :  { %v2455_v49 = vpop.f32.mrf.mxu0 }
 0x140   :  { %v2456_v50 = vadd.f32 %v2455_v49, %v2454_v47  ;;  %v2519_v51 = vpop.f32.mrf.mxu1 }
 0x141   :  { %v2520_v52 = vadd.f32 %v2519_v51, %v2518_v48  ;;  %v3257_v53 = vpop.f32.mrf.mxu0 }
 0x142   :  { %v3259_v54 = vpop.f32.mrf.mxu1 }
 0x143   :  { %v3261_v55 = vadd.f32 %v2520_v52, %v2456_v50  ;;  %v3263_v56 = vpop.f32.mrf.mxu0 }
 0x144   :  { %v3265_v57 = vpop.f32.mrf.mxu1 }
 0x145   :  { %v2460_v58 = vpop.f32.mrf.mxu0 }
 0x146   :  { %v2524_v59 = vpop.f32.mrf.mxu1 }
 0x147   :  { %v2461_v60 = vpop.f32.mrf.mxu0 }
 0x148   :  { %v2462_v61 = vadd.f32 %v2461_v60, %v2460_v58  ;;  %v2525_v62 = vpop.f32.mrf.mxu1 }
 0x149   :  { %v2526_v63 = vadd.f32 %v2525_v62, %v2524_v59  ;;  %v3267_v0 = vpop.f32.mrf.mxu0 }
 0x14a   :  { %v3269_v1 = vpop.f32.mrf.mxu1 }
 0x14b   :  { %v3271_v2 = vadd.f32 %v2526_v63, %v2462_v61  ;;  %v3273_v3 = vpop.f32.mrf.mxu0 }
 0x14c   :  { %v3275_v4 = vpop.f32.mrf.mxu1 }
 0x14d   :  { %v2466_v5 = vpop.f32.mrf.mxu0 }
 0x14e   :  { %v2530_v6 = vpop.f32.mrf.mxu1 }
 0x14f   :  { %v2467_v7 = vpop.f32.mrf.mxu0 }
 0x150   :  { %v2468_v8 = vadd.f32 %v2467_v7, %v2466_v5  ;;  %v2531_v9 = vpop.f32.mrf.mxu1 }
 0x151   :  { %v2532_v10 = vadd.f32 %v2531_v9, %v2530_v6  ;;  %v3277_v11 = vpop.f32.mrf.mxu0  ;;  %v2447_v9 = vadd.f32 %v3243_v34, %v3237_v31 }
 0x152   :  { %v3279_v12 = vpop.f32.mrf.mxu1 }
 0x153   :  { %v3281_v13 = vadd.f32 %v2532_v10, %v2468_v8  ;;  %v3283_v14 = vpop.f32.mrf.mxu0  ;;  %v2511_v10 = vadd.f32 %v3245_v35, %v3239_v32 }
 0x154   :  { %v3285_v15 = vpop.f32.mrf.mxu1 }
 0x155   :  { %v2472_v16 = vpop.f32.mrf.mxu0 }
 0x156   :  { %v2536_v17 = vpop.f32.mrf.mxu1 }
 0x157   :  { %v2473_v18 = vpop.f32.mrf.mxu0 }
 0x158   :  { %v2474_v19 = vadd.f32 %v2473_v18, %v2472_v16  ;;  %v2537_v20 = vpop.f32.mrf.mxu1 }
 0x159   :  { %v2538_v21 = vadd.f32 %v2537_v20, %v2536_v17  ;;  %v3287_v22 = vpop.f32.mrf.mxu0 }
 0x15a   :  { %v3289_v23 = vpop.f32.mrf.mxu1 }
 0x15b   :  { %v3291_v25 = vadd.f32 %v2538_v21, %v2474_v19  ;;  %v3293_v26 = vpop.f32.mrf.mxu0 }
 0x15c   :  { %v3295_v27 = vpop.f32.mrf.mxu1 }
 0x15d   :  { %v2478_v28 = vpop.f32.mrf.mxu0 }
 0x15e   :  { %v2542_v29 = vpop.f32.mrf.mxu1 }
 0x15f   :  { %v2479_v30 = vpop.f32.mrf.mxu0 }
 0x160   :  { %v2480_v36 = vadd.f32 %v2479_v30, %v2478_v28  ;;  %v2543_v37 = vpop.f32.mrf.mxu1 }
 0x161   :  { %v2544_v38 = vadd.f32 %v2543_v37, %v2542_v29  ;;  %v3297_v39 = vpop.f32.mrf.mxu0  ;;  %v1193_v29 = vadd.f32 %v2511_v10, %v2447_v9 }
 0x162   :  { %v3299_v40 = vpop.f32.mrf.mxu1 }
 0x163   :  { %v3301_v41 = vadd.f32 %v2544_v38, %v2480_v36  ;;  %v3303_v47 = vpop.f32.mrf.mxu0  ;;  %v3325_v38 = vld [vmem:[%s3471_s2] ss:$0 sm:$0xff] }
 0x164   :  { %v3305_v48 = vpop.f32.mrf.mxu1 }
 0x165   :  { %v2484_v49 = vpop.f32.mrf.mxu0 }
 0x166   :  { %v2548_v50 = vpop.f32.mrf.mxu1 }
 0x167   :  { %v2485_v51 = vpop.f32.mrf.mxu0 }
 0x168   :  { %v2486_v52 = vadd.f32 %v2485_v51, %v2484_v49  ;;  %v2549_v58 = vpop.f32.mrf.mxu1  ;;  %v2453_v49 = vadd.f32 %v3253_v45, %v3247_v42 }
 0x169   :  { %v2550_v59 = vadd.f32 %v2549_v58, %v2548_v50  ;;  %v3307_v60 = vpop.f32.mrf.mxu0 }
 0x16a   :  { %v3309_v61 = vpop.f32.mrf.mxu1 }
 0x16b   :  { %v3311_v62 = vadd.f32 %v2550_v59, %v2486_v52  ;;  %v3313_v63 = vpop.f32.mrf.mxu0 }
 0x16c   :  { %v3315_v5 = vpop.f32.mrf.mxu1 }
 0x16d   :  { %v2570_v6 = vpop.f32.mrf.mxu0 }
 0x16e   :  { %v2634_v7 = vpop.f32.mrf.mxu1 }
 0x16f   :  { %v2571_v8 = vpop.f32.mrf.mxu0 }
 0x170   :  { %v2572_v16 = vadd.f32 %v2571_v8, %v2570_v6  ;;  %v2635_v17 = vpop.f32.mrf.mxu1 }
 0x171   :  { %v2573_v18 = vpop.f32.mrf.mxu0  ;;  %v2636_v20 = vadd.f32 %v2635_v17, %v2634_v7 }
 0x172   :  { %v1287_v19 = vadd.f32 %v2572_v16, %v3241_v33  ;;  %v2637_v21 = vpop.f32.mrf.mxu1  ;;  %v2517_v33 = vadd.f32 %v3255_v46, %v3249_v43 }
 0x173   :  { %v2574_v28 = vpop.f32.mrf.mxu0 }
 0x174   :  { %v1384_v30 = vadd.f32 %v2636_v20, %v1287_v19  ;;  %v2575_v36 = vadd.f32 %v2574_v28, %v2573_v18  ;;  %v2638_v37 = vpop.f32.mrf.mxu1  ;;  %v1201_v16 = vadd.f32 %v2517_v33, %v2453_v49 }
 0x175   :  { %v2576_v31 = vpop.f32.mrf.mxu0  ;;  %v2639_v32 = vadd.f32 %v2638_v37, %v2637_v21 }
 0x176   :  { %v1290_v34 = vadd.f32 %v2575_v36, %v1193_v29  ;;  %v2640_v35 = vpop.f32.mrf.mxu1  ;;  %v1446_v51 = vadd.f32 %v3325_v38, %v1384_v30  ;;  %v2459_v30 = vadd.f32 %v3263_v56, %v3257_v53 }
 0x177   :  { %v2577_v50 = vpop.f32.mrf.mxu0 }
 0x178   :  { %v1387_v52 = vadd.f32 %v2639_v32, %v1290_v34  ;;  %v2578_v58 = vadd.f32 %v2577_v50, %v2576_v31  ;;  %v2641_v59 = vpop.f32.mrf.mxu1  ;;  %v1497_v18 = vmax.f32 %v1446_v51, 0.0 }
 0x179   :  { %v2579_v6 = vpop.f32.mrf.mxu0  ;;  %v2642_v9 = vadd.f32 %v2641_v59, %v2640_v35 }
 0x17a   :  { %v1447_v7 = vadd.f32 %v3325_v38, %v1387_v52  ;;  %v1295_v8 = vadd.f32 %v2578_v58, %v3251_v44  ;;  %v2643_v10 = vpop.f32.mrf.mxu1  ;;  %v2523_v44 = vadd.f32 %v3265_v57, %v3259_v54 }
 0x17b   :  { %v2580_v17 = vpop.f32.mrf.mxu0 }
 0x17c   :  { %v1498_v42 = vmax.f32 %v1447_v7, 0.0  ;;  %v1392_v45 = vadd.f32 %v2642_v9, %v1295_v8  ;;  %v2581_v19 = vadd.f32 %v2580_v17, %v2579_v6  ;;  %v2644_v43 = vpop.f32.mrf.mxu1  ;;  %v1209_v52 = vadd.f32 %v2523_v44, %v2459_v30 }
 0x17d   :  { %v2582_v46 = vpop.f32.mrf.mxu0  ;;  %v2645_v21 = vadd.f32 %v2644_v43, %v2643_v10  ;;  %v2465_v17 = vadd.f32 %v3273_v3, %v3267_v0  ;;  %v2977_v0 = vld [vmem:[#allocation12 + $0x28] sm:$0xff]  }
 0x17e   :  { %v1298_v20 = vadd.f32 %v2581_v19, %v1201_v16  ;;  %v2646_v28 = vpop.f32.mrf.mxu1  ;;  %v1513_v29 = vpack.c.bf16 %v1498_v42, %v1497_v18  ;;  %v1448_v37 = vadd.f32 %v3325_v38, %v1392_v45  ;;  %v2976_v16 = vld [vmem:[#allocation12 + $0x30] sm:$0xff]  }
 0x17f   :  { %v2583_v36 = vpop.f32.mrf.mxu0 }
 0x180   :  { %v1395_v31 = vadd.f32 %v2645_v21, %v1298_v20  ;;  %v2584_v34 = vadd.f32 %v2583_v36, %v2582_v46  ;;  %v2647_v32 = vpop.f32.mrf.mxu1  ;;  %2762 = vmatprep.mubr.bf16.mxu0 %v1513_v29  ;;  %v1499_v53 = vmax.f32 %v1448_v37, 0.0 }
 0x181   :  { %v2585_v35 = vpop.f32.mrf.mxu0  ;;  %v2648_v50 = vadd.f32 %v2647_v32, %v2646_v28 }
 0x182   :  { %v1449_v49 = vadd.f32 %v3325_v38, %v1395_v31  ;;  %v1303_v33 = vadd.f32 %v2584_v34, %v3261_v55  ;;  %v2649_v51 = vpop.f32.mrf.mxu1  ;;  %v2529_v55 = vadd.f32 %v3275_v4, %v3269_v1 }
 0x183   :  { %v2586_v58 = vpop.f32.mrf.mxu0 }
 0x184   :  { %v1500_v56 = vmax.f32 %v1449_v49, 0.0  ;;  %v1400_v59 = vadd.f32 %v2648_v50, %v1303_v33  ;;  %v2587_v54 = vadd.f32 %v2586_v58, %v2585_v35  ;;  %v2650_v57 = vpop.f32.mrf.mxu1  ;;  %v1217_v3 = vadd.f32 %v2529_v55, %v2465_v17  ;;  %v2978_v49 = vld [vmem:[#allocation12 + $0x20] sm:$0xff]  }
 0x185   :  { %v2588_v6 = vpop.f32.mrf.mxu0  ;;  %v2651_v9 = vadd.f32 %v2650_v57, %v2649_v51  ;;  %v2535_v33 = vadd.f32 %v3285_v15, %v3279_v12 }
 0x186   :  { %v1514_v7 = vpack.c.bf16 %v1500_v56, %v1499_v53  ;;  %v1306_v8 = vadd.f32 %v2587_v54, %v1209_v52  ;;  %v2652_v10 = vpop.f32.mrf.mxu1  ;;  %v1450_v42 = vadd.f32 %v3325_v38, %v1400_v59 }
 0x187   :  { %v2589_v18 = vpop.f32.mrf.mxu0 }
 0x188   :  { %v1403_v45 = vadd.f32 %v2651_v9, %v1306_v8  ;;  %v2590_v19 = vadd.f32 %v2589_v18, %v2588_v6  ;;  %v2653_v43 = vpop.f32.mrf.mxu1  ;;  %2763 = vmatmul.mubr.bf16.vlgmr.msra.gmra.mxu0 %v1514_v7  ;;  %v1501_v4 = vmax.f32 %v1450_v42, 0.0 }
 0x189   :  { %v2591_v46 = vpop.f32.mrf.mxu0  ;;  %2811 = vmatpush3.bf16.msra.mxu0 %v3234_v24  ;;  %v2654_v28 = vadd.f32 %v2653_v43, %v2652_v10 }
 0x18a   :  { %v1451_v20 = vadd.f32 %v3325_v38, %v1403_v45  ;;  %v1311_v21 = vadd.f32 %v2590_v19, %v3271_v2  ;;  %v2655_v29 = vpop.f32.mrf.mxu1  ;;  %2812 = vmatprep.subr.bf16.mxu0 %v2976_v16  ;;  %v2471_v2 = vadd.f32 %v3283_v14, %v3277_v11  ;;  %v2979_v11 = vld [vmem:[#allocation12 + $0x18] sm:$0xff]   ;;  %v2980_v45 = vld [vmem:[#allocation12 + $0x10] sm:$0xff]   ;;  %v2541_v19 = vadd.f32 %v3295_v27, %v3289_v23 }
 0x18b   :  { %v2592_v1 = vpop.f32.mrf.mxu0 }
 0x18c   :  { %v1502_v30 = vmax.f32 %v1451_v20, 0.0  ;;  %v1408_v44 = vadd.f32 %v2654_v28, %v1311_v21  ;;  %v2593_v36 = vadd.f32 %v2592_v1, %v2591_v46  ;;  %v2656_v37 = vpop.f32.mrf.mxu1  ;;  %v1225_v14 = vadd.f32 %v2535_v33, %v2471_v2 }
 0x18d   :  { %v2594_v31 = vpop.f32.mrf.mxu0  ;;  %2813 = vmatpush3.bf16.msra.mxu0 %v2976_v16  ;;  %v2657_v32 = vadd.f32 %v2656_v37, %v2655_v29  ;;  %v2547_v2 = vadd.f32 %v3305_v48, %v3299_v40 }
 0x18e   :  { %v1314_v34 = vadd.f32 %v2593_v36, %v1217_v3  ;;  %v2658_v24 = vpop.f32.mrf.mxu1  ;;  %v1515_v35 = vpack.c.bf16 %v1502_v30, %v1501_v4  ;;  %2814 = vmatprep.subr.bf16.mxu0 %v2977_v0  ;;  %v1452_v51 = vadd.f32 %v3325_v38, %v1408_v44 }
 0x18f   :  { %v2595_v50 = vpop.f32.mrf.mxu0 }
 0x190   :  { %v1411_v52 = vadd.f32 %v2657_v32, %v1314_v34  ;;  %v2596_v58 = vadd.f32 %v2595_v50, %v2594_v31  ;;  %v2659_v53 = vpop.f32.mrf.mxu1  ;;  %2766 = vmatprep.mubr.bf16.mxu0 %v1515_v35  ;;  %v1503_v12 = vmax.f32 %v1452_v51, 0.0 }
 0x191   :  { %v2597_v56 = vpop.f32.mrf.mxu0  ;;  %2815 = vmatpush3.bf16.msra.mxu0 %v2977_v0  ;;  %v2660_v57 = vadd.f32 %v2659_v53, %v2658_v24 }
 0x192   :  { %v1453_v59 = vadd.f32 %v3325_v38, %v1411_v52  ;;  %v1319_v54 = vadd.f32 %v2596_v58, %v3281_v13  ;;  %v2661_v6 = vpop.f32.mrf.mxu1  ;;  %2816 = vmatprep.subr.bf16.mxu0 %v2978_v49  ;;  %v2477_v13 = vadd.f32 %v3293_v26, %v3287_v22  ;;  %v2981_v22 = vld [vmem:[#allocation12 + $0x8] sm:$0xff]  }
 0x193   :  { %v2598_v7 = vpop.f32.mrf.mxu0 }
 0x194   :  { %v1504_v15 = vmax.f32 %v1453_v59, 0.0  ;;  %v1416_v8 = vadd.f32 %v2660_v57, %v1319_v54  ;;  %v2599_v9 = vadd.f32 %v2598_v7, %v2597_v56  ;;  %v2662_v10 = vpop.f32.mrf.mxu1  ;;  %v1233_v26 = vadd.f32 %v2541_v19, %v2477_v13 }
 0x195   :  { %v2600_v16 = vpop.f32.mrf.mxu0  ;;  %2817 = vmatpush3.bf16.msra.mxu0 %v2978_v49  ;;  %v2663_v55 = vadd.f32 %v2662_v10, %v2661_v6  ;;  %v2982_v49 = vld [vmem:[#allocation12] sm:$0xff]   ;;  %v2489_v10 = vadd.f32 %v3313_v63, %v3307_v60 }
 0x196   :  { %v1322_v17 = vadd.f32 %v2599_v9, %v1225_v14  ;;  %v2664_v18 = vpop.f32.mrf.mxu1  ;;  %v1516_v42 = vpack.c.bf16 %v1504_v15, %v1503_v12  ;;  %2818 = vmatprep.subr.bf16.mxu0 %v2979_v11  ;;  %v1454_v46 = vadd.f32 %v3325_v38, %v1416_v8 }
 0x197   :  { %v2601_v43 = vpop.f32.mrf.mxu0 }
 0x198   :  { %v1419_v20 = vadd.f32 %v2663_v55, %v1322_v17  ;;  %v2602_v21 = vadd.f32 %v2601_v43, %v2600_v16  ;;  %v2665_v28 = vpop.f32.mrf.mxu1  ;;  %2767 = vmatmul.mubr.bf16.gmra.mxu0 %v1516_v42  ;;  %v1505_v23 = vmax.f32 %v1454_v46, 0.0 }
 0x199   :  { %v2603_v29 = vpop.f32.mrf.mxu0  ;;  %2819 = vmatpush3.bf16.msra.mxu0 %v2979_v11  ;;  %v2666_v1 = vadd.f32 %v2665_v28, %v2664_v18 }
 0x19a   :  { %v1455_v0 = vadd.f32 %v3325_v38, %v1419_v20  ;;  %v1327_v3 = vadd.f32 %v2602_v21, %v3291_v25  ;;  %v2667_v4 = vpop.f32.mrf.mxu1  ;;  %2820 = vmatprep.subr.bf16.mxu0 %v2980_v45  ;;  %v2483_v25 = vadd.f32 %v3303_v47, %v3297_v39 }
 0x19b   :  { %v2604_v30 = vpop.f32.mrf.mxu0 }
 0x19c   :  { %v1506_v27 = vmax.f32 %v1455_v0, 0.0  ;;  %v1424_v44 = vadd.f32 %v2666_v1, %v1327_v3  ;;  %v2605_v36 = vadd.f32 %v2604_v30, %v2603_v29  ;;  %v2668_v37 = vpop.f32.mrf.mxu1  ;;  %v1241_v39 = vadd.f32 %v2547_v2, %v2483_v25  ;;  %v3380_v1 = vld [vmem:[%s3476_s7] ss:$0 sm:$0xff] }
 0x19d   :  { %v2606_v31 = vpop.f32.mrf.mxu0  ;;  %2821 = vmatpush3.bf16.msra.mxu0 %v2980_v45  ;;  %v2669_v32 = vadd.f32 %v2668_v37, %v2667_v4 }
 0x19e   :  { %v1330_v34 = vadd.f32 %v2605_v36, %v1233_v26  ;;  %v2670_v24 = vpop.f32.mrf.mxu1  ;;  %v1517_v35 = vpack.c.bf16 %v1506_v27, %v1505_v23  ;;  %2822 = vmatprep.subr.bf16.mxu0 %v2981_v22  ;;  %v1456_v50 = vadd.f32 %v3325_v38, %v1424_v44 }
 0x19f   :  { %v2607_v33 = vpop.f32.mrf.mxu0 }
 0x1a0   :  { %v1427_v51 = vadd.f32 %v2669_v32, %v1330_v34  ;;  %v2608_v52 = vadd.f32 %v2607_v33, %v2606_v31  ;;  %v2671_v58 = vpop.f32.mrf.mxu1  ;;  %2770 = vmatprep.mubr.bf16.mxu0 %v1517_v35  ;;  %v1507_v6 = vmax.f32 %v1456_v50, 0.0 }
 0x1a1   :  { %v2609_v53 = vpop.f32.mrf.mxu0  ;;  %2823 = vmatpush3.bf16.msra.mxu0 %v2981_v22  ;;  %v2672_v54 = vadd.f32 %v2671_v58, %v2670_v24 }
 0x1a2   :  { %v1457_v56 = vadd.f32 %v3325_v38, %v1427_v51  ;;  %v1335_v59 = vadd.f32 %v2608_v52, %v3301_v41  ;;  %v2673_v57 = vpop.f32.mrf.mxu1  ;;  %2824 = vmatprep.subr.bf16.mxu0 %v2982_v49  ;;  %v2553_v41 = vadd.f32 %v3315_v5, %v3309_v61 }
 0x1a3   :  { %v2610_v47 = vpop.f32.mrf.mxu0 }
 0x1a4   :  { %v1508_v40 = vmax.f32 %v1457_v56, 0.0  ;;  %v1432_v48 = vadd.f32 %v2672_v54, %v1335_v59  ;;  %v2611_v11 = vadd.f32 %v2610_v47, %v2609_v53  ;;  %v2674_v14 = vpop.f32.mrf.mxu1  ;;  %v1249_v20 = vadd.f32 %v2553_v41, %v2489_v10 }
 0x1a5   :  { %v2612_v7 = vpop.f32.mrf.mxu0  ;;  %2825 = vmatpush3.bf16.msra.mxu0 %v2982_v49  ;;  %v2675_v15 = vadd.f32 %v2674_v14, %v2673_v57 }
 0x1a6   :  { %v1338_v12 = vadd.f32 %v2611_v11, %v1241_v39  ;;  %v2676_v8 = vpop.f32.mrf.mxu1  ;;  %v1518_v9 = vpack.c.bf16 %v1508_v40, %v1507_v6  ;;  %v1458_v17 = vadd.f32 %v3325_v38, %v1432_v48 }
 0x1a7   :  { %v2613_v16 = vpop.f32.mrf.mxu0 }
 0x1a8   :  { %v1435_v55 = vadd.f32 %v2675_v15, %v1338_v12  ;;  %v2614_v18 = vadd.f32 %v2613_v16, %v2612_v7  ;;  %v2677_v42 = vpop.f32.mrf.mxu1  ;;  %2771 = vmatmul.mubr.bf16.gmra.mxu0 %v1518_v9  ;;  %v1509_v60 = vmax.f32 %v1458_v17, 0.0 }
 0x1a9   :  { %v2615_v45 = vpop.f32.mrf.mxu0  ;;  %v2678_v43 = vadd.f32 %v2677_v42, %v2676_v8 }
 0x1aa   :  { %v1459_v13 = vadd.f32 %v3325_v38, %v1435_v55  ;;  %v1343_v19 = vadd.f32 %v2614_v18, %v3311_v62  ;;  %v2679_v46 = vpop.f32.mrf.mxu1 }
 0x1ab   :  { %v2616_v21 = vpop.f32.mrf.mxu0 }
 0x1ac   :  { %v1510_v63 = vmax.f32 %v1459_v13, 0.0  ;;  %v1440_v28 = vadd.f32 %v2678_v43, %v1343_v19  ;;  %v2617_v61 = vadd.f32 %v2616_v21, %v2615_v45  ;;  %v2680_v5 = vpop.f32.mrf.mxu1 }
 0x1ad   :  { %v2681_v0 = vadd.f32 %v2680_v5, %v2679_v46 }
 0x1ae   :  { %v1346_v29 = vadd.f32 %v2617_v61, %v1249_v20  ;;  %v2796_v3 = vpop.f32.mrf.mxu1  ;;  %v1519_v4 = vpack.c.bf16 %v1510_v63, %v1509_v60  ;;  %v1460_v62 = vadd.f32 %v3325_v38, %v1440_v28 }
 0x1af   :  { %v1867_v32 = vadd.f32 %v2796_v3, %v3380_v1  ;;  %v2391_v3 = vld [vmem:[%s3473_s4] ss:$0 sm:$0xff] }
 0x1b0   :  { %v1443_v22 = vadd.f32 %v2681_v0, %v1346_v29  ;;  %v1858_v26 = vpop.f32.mrf.mxu1  ;;  %2774 = vmatprep.mubr.bf16.mxu0 %v1519_v4  ;;  %v1511_v44 = vmax.f32 %v1460_v62, 0.0 }
 0x1b1   :  { %v1859_v30 = vadd.f32 %v3380_v1, %v1858_v26 }
 0x1b2   :  { %v1461_v23 = vadd.f32 %v3325_v38, %v1443_v22  ;;  %v2797_v27 = vpop.f32.mrf.mxu1  ;;  %v1923_v38 = vmax.f32 %v1867_v32, 0.0 }
 0x1b3   :  { %v1921_v31 = vmax.f32 %v1859_v30, 0.0  ;;  %v1870_v24 = vadd.f32 %v2797_v27, %v3380_v1 }
 0x1b4   :  { %v1512_v36 = vmax.f32 %v1461_v23, 0.0  ;;  %v1861_v37 = vpop.f32.mrf.mxu1 }
 0x1b5   :  { %v1862_v34 = vadd.f32 %v3380_v1, %v1861_v37  ;;  %v1924_v51 = vmax.f32 %v1870_v24, 0.0 }
 0x1b6   :  { %v2800_v35 = vpop.f32.mrf.mxu1  ;;  %v1520_v49 = vpack.c.bf16 %v1512_v36, %v1511_v44 }
 0x1b7   :  { %v1922_v25 = vmax.f32 %v1862_v34, 0.0  ;;  %v1938_v59 = vpack.c.bf16 %v1924_v51, %v1923_v38  ;;  %v1883_v54 = vadd.f32 %v2800_v35, %v3380_v1 }
 0x1b8   :  { %v1874_v2 = vpop.f32.mrf.mxu1  ;;  %2775 = vmatmul.mubr.bf16.gmra.mxu0 %v1520_v49 }
 0x1b9   :  { %v1937_v33 = vpack.c.bf16 %v1922_v25, %v1921_v31  ;;  %v1875_v50 = vadd.f32 %v3380_v1, %v1874_v2  ;;  %v1927_v11 = vmax.f32 %v1883_v54, 0.0 }
 0x1ba   :  { %v2801_v52 = vpop.f32.mrf.mxu1 }
 0x1bb   :  { %2826 = vmatprep.mubr.bf16.mxu0 %v1937_v33  ;;  %v1925_v53 = vmax.f32 %v1875_v50, 0.0  ;;  %v1886_v57 = vadd.f32 %v2801_v52, %v3380_v1 }
 0x1bc   :  { %v1877_v58 = vpop.f32.mrf.mxu1 }
 0x1bd   :  { %v1878_v56 = vadd.f32 %v3380_v1, %v1877_v58  ;;  %v1928_v14 = vmax.f32 %v1886_v57, 0.0 }
 0x1be   :  { %v2804_v39 = vpop.f32.mrf.mxu1 }
 0x1bf   :  { %v1926_v47 = vmax.f32 %v1878_v56, 0.0  ;;  %v1940_v9 = vpack.c.bf16 %v1928_v14, %v1927_v11  ;;  %v1899_v10 = vadd.f32 %v2804_v39, %v3380_v1 }
 0x1c0   :  { %v1890_v6 = vpop.f32.mrf.mxu1  ;;  %2827 = vmatmul.mubr.bf16.vlgmr.msra.gmra.mxu0 %v1938_v59 }
 0x1c1   :  { %v1939_v40 = vpack.c.bf16 %v1926_v47, %v1925_v53  ;;  %v1891_v48 = vadd.f32 %v3380_v1, %v1890_v6  ;;  %v1931_v45 = vmax.f32 %v1899_v10, 0.0 }
 0x1c2   :  { %v2805_v7 = vpop.f32.mrf.mxu1 }
 0x1c3   :  { %2830 = vmatprep.mubr.bf16.mxu0 %v1939_v40  ;;  %v1929_v15 = vmax.f32 %v1891_v48, 0.0  ;;  %v1902_v41 = vadd.f32 %v2805_v7, %v3380_v1 }
 0x1c4   :  { %v1893_v12 = vpop.f32.mrf.mxu1 }
 0x1c5   :  { %v1894_v8 = vadd.f32 %v3380_v1, %v1893_v12  ;;  %v1932_v13 = vmax.f32 %v1902_v41, 0.0 }
 0x1c6   :  { %v2808_v16 = vpop.f32.mrf.mxu1 }
 0x1c7   :  { %v1930_v17 = vmax.f32 %v1894_v8, 0.0  ;;  %v1942_v21 = vpack.c.bf16 %v1932_v13, %v1931_v45  ;;  %v1915_v60 = vadd.f32 %v2808_v16, %v3380_v1 }
 0x1c8   :  { %v1906_v55 = vpop.f32.mrf.mxu1  ;;  %2831 = vmatmul.mubr.bf16.gmra.mxu0 %v1940_v9  ;;  %v2417_v9 = vld [vmem:[%s3478_s9] ss:$0 sm:$0xff]  ;;  %s3143_s9 = smov [#allocation14]  }
 0x1c9   :  { %v1941_v18 = vpack.c.bf16 %v1930_v17, %v1929_v15  ;;  %v1907_v42 = vadd.f32 %v3380_v1, %v1906_v55  ;;  %v1935_v5 = vmax.f32 %v1915_v60, 0.0  ;;  %s2247_s26 = sshll.u32 %s3143_s9, 4  ;;  %s2248_s26 = int_to_ptr.vmem [resolvable:$true] %s2247_s26 }
 0x1ca   :  { %v2809_v19 = vpop.f32.mrf.mxu1  ;;  %s3103_s1 = scalar_lea.vmem %s2248_s26, 2048  ;;  %p3108_p3 = scmp.lt.s32.totalorder %s2248_s26, %s2248_s26 }
 0x1cb   :  { %2834 = vmatprep.mubr.bf16.mxu0 %v1941_v18  ;;  %v1933_v46 = vmax.f32 %v1907_v42, 0.0  ;;  %v1918_v63 = vadd.f32 %v2809_v19, %v3380_v1  ;;  %p3104_p2 = scmp.ne.s32.totalorder %s2248_s26, %s3103_s1  ;;  %p3109_p4 = scmp.lt.s32.totalorder %s3103_s1, %s3103_s1 }
 0x1cc   :  { %v1909_v43 = vpop.f32.mrf.mxu1 }
 0x1cd   :  { %v1910_v20 = vadd.f32 %v3380_v1, %v1909_v43  ;;  %v1936_v29 = vmax.f32 %v1918_v63, 0.0  ;;  %p3110_p5 = por %p3109_p4, %p3108_p3 }
 0x1cf   :  { %v1934_v28 = vmax.f32 %v1910_v20, 0.0  ;;  %v1944_v0 = vpack.c.bf16 %v1936_v29, %v1935_v5  ;;  %p3111_p6 = pnand %p3110_p5, %p3104_p2 }
 0x1d0   :  { %2835 = vmatmul.mubr.bf16.gmra.mxu0 %v1942_v21 }
 0x1d1   :  { %v1943_v61 = vpack.c.bf16 %v1934_v28, %v1933_v46 }
 0x1d3   :  { %2838 = vmatprep.mubr.bf16.mxu0 %v1943_v61 }
 0x1d8   :  { %2839 = vmatmul.mubr.bf16.gmra.mxu0 %v1944_v0 }
 0x248   :  { %v2764_v4 = vpop.f32.mrf.mxu0 }
 0x249   :  { %v3403_v62 = vadd.f32 %v2764_v4, %v2391_v3 }
 0x24a   :  { %v1626_v22 = vpop.f32.mrf.mxu0 }
 0x24b   :  { %v1627_v23 = vadd.f32 %v2391_v3, %v1626_v22 }
 0x24c   :  { %v2765_v26 = vpop.f32.mrf.mxu0 }
 0x24d   :  { %v3405_v30 = vadd.f32 %v2765_v26, %v2391_v3 }
 0x24e   :  { %v1629_v1 = vpop.f32.mrf.mxu0 }
 0x24f   :  { %v2114_v27 = vpack.c.bf16 %v3405_v30, %v3403_v62  ;;  %v1630_v44 = vadd.f32 %v2391_v3, %v1629_v1 }
 0x251   :  { %v2113_v36 = vpack.c.bf16 %v1630_v44, %v1627_v23 }
 0x253   :  { %2858 = vmatprep.mubr.bf16.mxu1 %v2113_v36 }
 0x258   :  { %v2768_v37 = vpop.f32.mrf.mxu0 }
 0x259   :  { %v3409_v31 = vadd.f32 %v2768_v37, %v2391_v3 }
 0x25a   :  { %v1642_v34 = vpop.f32.mrf.mxu0 }
 0x25b   :  { %v3411_v32 = vadd.f32 %v2391_v3, %v1642_v34 }
 0x25c   :  { %v2769_v24 = vpop.f32.mrf.mxu0 }
 0x25d   :  { %v3413_v35 = vadd.f32 %v2769_v24, %v2391_v3 }
 0x25e   :  { %v1645_v49 = vpop.f32.mrf.mxu0 }
 0x25f   :  { %v2116_v25 = vpack.c.bf16 %v3413_v35, %v3409_v31  ;;  %v3417_v2 = vadd.f32 %v2391_v3, %v1645_v49 }
 0x261   :  { %v2115_v33 = vpack.c.bf16 %v3417_v2, %v3411_v32 }
 0x268   :  { %v2772_v50 = vpop.f32.mrf.mxu0 }
 0x269   :  { %v3421_v38 = vadd.f32 %v2772_v50, %v2391_v3 }
 0x26a   :  { %v1658_v51 = vpop.f32.mrf.mxu0 }
 0x26b   :  { %v3423_v52 = vadd.f32 %v2391_v3, %v1658_v51 }
 0x26c   :  { %v2773_v58 = vpop.f32.mrf.mxu0 }
 0x26d   :  { %v3425_v53 = vadd.f32 %v2773_v58, %v2391_v3 }
 0x26e   :  { %v1661_v56 = vpop.f32.mrf.mxu0 }
 0x26f   :  { %v2118_v59 = vpack.c.bf16 %v3425_v53, %v3421_v38  ;;  %v3429_v54 = vadd.f32 %v2391_v3, %v1661_v56 }
 0x271   :  { %v2117_v57 = vpack.c.bf16 %v3429_v54, %v3423_v52 }
 0x278   :  { %v2776_v39 = vpop.f32.mrf.mxu0 }
 0x279   :  { %v3433_v47 = vadd.f32 %v2776_v39, %v2391_v3 }
 0x27a   :  { %v1674_v6 = vpop.f32.mrf.mxu0 }
 0x27b   :  { %v3435_v40 = vadd.f32 %v2391_v3, %v1674_v6 }
 0x27c   :  { %v2777_v48 = vpop.f32.mrf.mxu0 }
 0x27d   :  { %v3437_v11 = vadd.f32 %v2777_v48, %v2391_v3 }
 0x27e   :  { %v1677_v14 = vpop.f32.mrf.mxu0 }
 0x27f   :  { %v2120_v7 = vpack.c.bf16 %v3437_v11, %v3433_v47  ;;  %v3441_v12 = vadd.f32 %v2391_v3, %v1677_v14 }
 0x280   :  { %v2828_v15 = vpop.f32.mrf.mxu0 }
 0x281   :  { %v2119_v8 = vpack.c.bf16 %v3441_v12, %v3435_v40  ;;  %v2059_v16 = vadd.f32 %v2828_v15, %v2417_v9 }
 0x282   :  { %v2050_v10 = vpop.f32.mrf.mxu0 }
 0x283   :  { %v2051_v18 = vadd.f32 %v2417_v9, %v2050_v10 }
 0x284   :  { %v2829_v41 = vpop.f32.mrf.mxu0 }
 0x285   :  { %v2062_v17 = vadd.f32 %v2829_v41, %v2417_v9 }
 0x286   :  { %v2053_v55 = vpop.f32.mrf.mxu0 }
 0x287   :  { %v2122_v42 = vpack.c.bf16 %v2062_v17, %v2059_v16  ;;  %v2054_v45 = vadd.f32 %v2417_v9, %v2053_v55 }
 0x288   :  { %v2832_v13 = vpop.f32.mrf.mxu0 }
 0x289   :  { %v2121_v19 = vpack.c.bf16 %v2054_v45, %v2051_v18  ;;  %v2075_v51 = vadd.f32 %v2832_v13, %v2417_v9 }
 0x28a   :  { %v2066_v43 = vpop.f32.mrf.mxu0 }
 0x28b   :  { %v2067_v39 = vadd.f32 %v2417_v9, %v2066_v43 }
 0x28c   :  { %v2833_v46 = vpop.f32.mrf.mxu0 }
 0x28d   :  { %v2078_v50 = vadd.f32 %v2833_v46, %v2417_v9 }
 0x28e   :  { %v2069_v20 = vpop.f32.mrf.mxu0 }
 0x28f   :  { %v2124_v58 = vpack.c.bf16 %v2078_v50, %v2075_v51  ;;  %v2070_v56 = vadd.f32 %v2417_v9, %v2069_v20 }
 0x290   :  { %v2836_v21 = vpop.f32.mrf.mxu0 }
 0x291   :  { %v2091_v36 = vadd.f32 %v2836_v21, %v2417_v9  ;;  %v2123_v6 = vpack.c.bf16 %v2070_v56, %v2067_v39 }
 0x292   :  { %v2082_v60 = vpop.f32.mrf.mxu0 }
 0x293   :  { %v2083_v24 = vadd.f32 %v2417_v9, %v2082_v60 }
 0x294   :  { %v2837_v63 = vpop.f32.mrf.mxu0 }
 0x295   :  { %v2094_v44 = vadd.f32 %v2837_v63, %v2417_v9 }
 0x296   :  { %v2085_v28 = vpop.f32.mrf.mxu0 }
 0x297   :  { %v2126_v37 = vpack.c.bf16 %v2094_v44, %v2091_v36  ;;  %v2086_v34 = vadd.f32 %v2417_v9, %v2085_v28 }
 0x298   :  { %v2840_v61 = vpop.f32.mrf.mxu0 }
 0x299   :  { %v2107_v0 = vadd.f32 %v2840_v61, %v2417_v9  ;;  %v2125_v49 = vpack.c.bf16 %v2086_v34, %v2083_v24 }
 0x29a   :  { %v2098_v5 = vpop.f32.mrf.mxu0 }
 0x29b   :  { %v2099_v22 = vadd.f32 %v2417_v9, %v2098_v5 }
 0x29c   :  { %v2841_v29 = vpop.f32.mrf.mxu0 }
 0x29d   :  { %v2110_v3 = vadd.f32 %v2841_v29, %v2417_v9 }
 0x29e   :  { %v2101_v4 = vpop.f32.mrf.mxu0 }
 0x29f   :  { %v2128_v26 = vpack.c.bf16 %v2110_v3, %v2107_v0  ;;  %v2102_v1 = vadd.f32 %v2417_v9, %v2101_v4 }
 0x2a1   :  { %v2127_v23 = vpack.c.bf16 %v2102_v1, %v2099_v22  ;;  %2842 = vmatprep.subr.bf16.mxu1 %v2128_v26 }
 0x2a2   :  { %2843 = vmatpush3.bf16.xpose.msra.mxu1 %v2128_v26 }
 0x2a3   :  { %2844 = vmatprep.subr.bf16.mxu1 %v2127_v23 }
 0x2aa   :  { %2845 = vmatpush3.bf16.xpose.msra.mxu1 %v2127_v23 }
 0x2ab   :  { %2846 = vmatprep.subr.bf16.mxu1 %v2126_v37 }
 0x2b2   :  { %2847 = vmatpush3.bf16.xpose.msra.mxu1 %v2126_v37 }
 0x2b3   :  { %2848 = vmatprep.subr.bf16.mxu1 %v2125_v49 }
 0x2ba   :  { %2849 = vmatpush3.bf16.xpose.msra.mxu1 %v2125_v49 }
 0x2bb   :  { %2850 = vmatprep.subr.bf16.mxu1 %v2124_v58 }
 0x2c2   :  { %2851 = vmatpush3.bf16.xpose.msra.mxu1 %v2124_v58 }
 0x2c3   :  { %2852 = vmatprep.subr.bf16.mxu1 %v2123_v6 }
 0x2ca   :  { %2853 = vmatpush3.bf16.xpose.msra.mxu1 %v2123_v6 }
 0x2cb   :  { %2854 = vmatprep.subr.bf16.mxu1 %v2122_v42 }
 0x2d2   :  { %2855 = vmatpush3.bf16.xpose.msra.mxu1 %v2122_v42 }
 0x2d3   :  { %2856 = vmatprep.subr.bf16.mxu1 %v2121_v19 }
 0x2da   :  { %2857 = vmatpush3.bf16.xpose.msra.mxu1 %v2121_v19 }
 0x2e1   :  { %2859 = vmatmul.mubr.bf16.vlgmr.msra.gmra.mxu1 %v2114_v27 }
 0x2e2   :  { %2862 = vmatprep.mubr.bf16.mxu1 %v2115_v33 }
 0x2e9   :  { %2863 = vmatmul.mubr.bf16.gmra.mxu1 %v2116_v25 }
 0x2ea   :  { %2866 = vmatprep.mubr.bf16.mxu1 %v2117_v57 }
 0x2f1   :  { %2867 = vmatmul.mubr.bf16.gmra.mxu1 %v2118_v59 }
 0x2f2   :  { %2870 = vmatprep.mubr.bf16.mxu1 %v2119_v8 }
 0x2f9   :  { %2871 = vmatmul.mubr.bf16.gmra.mxu1 %v2120_v7 }
 0x3a1   :  { %v2860_v62 = vpop.f32.mrf.mxu1 }
 0x3a2   :  { %2228 = vst [vmem:[#allocation14 + $0x10] sm:$0xff] %v2860_v62 }
 0x3a3   :  { %v2163_v30 = vpop.f32.mrf.mxu1 }
 0x3a4   :  { %2226 = vst [vmem:[#allocation14] sm:$0xff] %v2163_v30 }
 0x3a5   :  { %v2861_v27 = vpop.f32.mrf.mxu1 }
 0x3a6   :  { %2229 = vst [vmem:[#allocation14 + $0x18] sm:$0xff] %v2861_v27 }
 0x3a7   :  { %v2166_v31 = vpop.f32.mrf.mxu1 }
 0x3a8   :  { %2227 = vst [vmem:[#allocation14 + $0x8] sm:$0xff] %v2166_v31 }
 0x3a9   :  { %v2864_v32 = vpop.f32.mrf.mxu1 }
 0x3aa   :  { %2232 = vst [vmem:[#allocation14 + $0x30] sm:$0xff] %v2864_v32 }
 0x3ab   :  { %v2179_v35 = vpop.f32.mrf.mxu1 }
 0x3ac   :  { %2230 = vst [vmem:[#allocation14 + $0x20] sm:$0xff] %v2179_v35 }
 0x3ad   :  { %v2865_v25 = vpop.f32.mrf.mxu1 }
 0x3ae   :  { %2233 = vst [vmem:[#allocation14 + $0x38] sm:$0xff] %v2865_v25 }
 0x3af   :  { %v2182_v2 = vpop.f32.mrf.mxu1 }
 0x3b0   :  { %2231 = vst [vmem:[#allocation14 + $0x28] sm:$0xff] %v2182_v2 }
 0x3b1   :  { %v2868_v33 = vpop.f32.mrf.mxu1 }
 0x3b2   :  { %2236 = vst [vmem:[#allocation14 + $0x50] sm:$0xff] %v2868_v33 }
 0x3b3   :  { %v2195_v38 = vpop.f32.mrf.mxu1 }
 0x3b4   :  { %2234 = vst [vmem:[#allocation14 + $0x40] sm:$0xff] %v2195_v38 }
 0x3b5   :  { %v2869_v52 = vpop.f32.mrf.mxu1 }
 0x3b6   :  { %2237 = vst [vmem:[#allocation14 + $0x58] sm:$0xff] %v2869_v52 }
 0x3b7   :  { %v2198_v53 = vpop.f32.mrf.mxu1 }
 0x3b8   :  { %2235 = vst [vmem:[#allocation14 + $0x48] sm:$0xff] %v2198_v53 }
 0x3b9   :  { %v2872_v59 = vpop.f32.mrf.mxu1 }
 0x3ba   :  { %2240 = vst [vmem:[#allocation14 + $0x70] sm:$0xff] %v2872_v59 }
 0x3bb   :  { %v2211_v54 = vpop.f32.mrf.mxu1 }
 0x3bc   :  { %2238 = vst [vmem:[#allocation14 + $0x60] sm:$0xff] %v2211_v54 }
 0x3bd   :  { %v2873_v57 = vpop.f32.mrf.mxu1 }
 0x3be   :  { %2241 = vst [vmem:[#allocation14 + $0x78] sm:$0xff] %v2873_v57 }
 0x3bf   :  { %v2214_v47 = vpop.f32.mrf.mxu1 }
 0x3c0   :  { %2239 = vst [vmem:[#allocation14 + $0x68] sm:$0xff] %v2214_v47 }
 0x3c1   :  { %3114 = shalt.err (!%p3111_p6)
}
 0x3c2   :  { %s3144_s27 = smov 128   ;;  %s3145_s28 = smov 8  }
 0x3c3   :  { %2253 = dma.vmem_to_hbm [thread:$0]  %s2248_s26, 2048, %s3479_s10, [#allocation5], %s3144_s27, %s3144_s27, %s3145_s28  }
 0x3c4   :  { %3131 = dma.done.wait [#allocation5], 2048  }
 0x3c5   :  { %3132 = vsyncadd [#allocation5], 4294965248 }
 0x3c6   :  { %2257 = vsyncpa [#allocation4], 1 }
 0x3c7   :  { %2258 = vsyncpa [#allocation7], 1 }
 0x3c8   :  { %2259 = vsyncpa [#allocation10], 1 }
 0x3c9   :  { %2260 = vsyncpa [#allocation13], 1 }
 0x3ca   :  { %2261 = vsyncpa [#allocation5], 1 }

</bundles_post_ra>
